<compile_context>
chip_gen: v7x
topology: tpu7x:2x2x1
jax: 0.10.0
libtpu: 0.0.40
codegen_flags: <defaults>
</compile_context>

<pallas_src>
import jax
import jax.numpy as jnp
from jax.experimental import pallas as pl
from jax.experimental.pallas import tpu as pltpu

LATENT = 20
HIDDEN = 400
OUT = 28 * 28        # 784
HIDDEN_PAD = 512     # 4 * 128 (lane-dense hidden)
OUT_PAD = 896        # 7 * 128 (lane-dense output -> unmasked stores)


def generator_kernel(z_ref, w1_ref, b1_ref, w2_ref, b2_ref, o_ref):
    # Layer 1: Linear(latent -> hidden) + ReLU  (MXU matmul, VPU max).
    # Bias stays a (1, N) row and broadcasts in the add.
    h = jnp.dot(z_ref[...], w1_ref[...], preferred_element_type=jnp.float32)
    h = jnp.maximum(h + b1_ref[...], 0.0)
    # Layer 2: Linear(hidden -> out) + Sigmoid  (MXU matmul, EUP exp + recip).
    y = jnp.dot(h, w2_ref[...], preferred_element_type=jnp.float32)
    y = y + b2_ref[...]
    e = jnp.exp(-y)                                   # EUP slot
    o_ref[...] = pl.reciprocal(1.0 + e, approx=False).astype(o_ref.dtype)


def _pick_batch_tile(B):
    # Small batches: one grid step holding the whole batch (pure-overhead case).
    if B <= 256:
        return B
    # Large batches: 256-row tiles match the 256-wide MXU on v6e/v7x and keep
    # >=2 parallel grid steps for v7x megacore; fall back to smaller divisors.
    for t in (256, 128, 64, 32, 16, 8):
        if B % t == 0:
            return t
    return B  # irregular batch: single full-extent tile (always legal)


def generator_forward(z, w1, b1, w2, b2, *, batch_tile=None):
    """z: (B, LATENT); w1: (LATENT, HIDDEN); b1: (1, HIDDEN) or (HIDDEN,);
    w2: (HIDDEN, OUT); b2: (1, OUT) or (OUT,).  Returns (B, OUT) float32."""
    B = z.shape[0]
    if batch_tile is None:
        batch_tile = _pick_batch_tile(B)
    assert B % batch_tile == 0, "batch must be a multiple of batch_tile"

    # Zero-pad feature dims to multiples of 128. relu(0 + 0) = 0 in the padded
    # hidden columns and the padded W2 rows are zero, so results are unchanged;
    # padded output columns are sliced off below.
    b1 = jnp.asarray(b1, jnp.float32).reshape(1, HIDDEN)
    b2 = jnp.asarray(b2, jnp.float32).reshape(1, OUT)
    w1p = jnp.pad(jnp.asarray(w1, jnp.float32), ((0, 0), (0, HIDDEN_PAD - HIDDEN)))
    b1p = jnp.pad(b1, ((0, 0), (0, HIDDEN_PAD - HIDDEN)))
    w2p = jnp.pad(jnp.asarray(w2, jnp.float32),
                  ((0, HIDDEN_PAD - HIDDEN), (0, OUT_PAD - OUT)))
    b2p = jnp.pad(b2, ((0, 0), (0, OUT_PAD - OUT)))

    grid = (B // batch_tile,)
    out_pad = pl.pallas_call(
        generator_kernel,
        out_shape=jax.ShapeDtypeStruct((B, OUT_PAD), jnp.float32),
        grid_spec=pltpu.PrefetchScalarGridSpec(
            num_scalar_prefetch=0,
            grid=grid,
            in_specs=[
                pl.BlockSpec((batch_tile, LATENT), lambda i: (i, 0)),    # z tile
                pl.BlockSpec((LATENT, HIDDEN_PAD), lambda i: (0, 0)),    # W1 (resident)
                pl.BlockSpec((1, HIDDEN_PAD), lambda i: (0, 0)),         # b1 (resident)
                pl.BlockSpec((HIDDEN_PAD, OUT_PAD), lambda i: (0, 0)),   # W2 (resident)
                pl.BlockSpec((1, OUT_PAD), lambda i: (0, 0)),            # b2 (resident)
            ],
            out_specs=pl.BlockSpec((batch_tile, OUT_PAD), lambda i: (i, 0)),
        ),
        compiler_params=pltpu.CompilerParams(
            dimension_semantics=("parallel",),
        ),
    )(z.astype(jnp.float32), w1p, b1p, w2p, b2p)
    return out_pad[:, :OUT]


def init_params(key):
    """Deterministic init mimicking PyTorch nn.Linear default U[-1/sqrt(fan_in), 1/sqrt(fan_in)]."""
    k1, k2, k3, k4 = jax.random.split(key, 4)
    bound1 = 1.0 / jnp.sqrt(LATENT)
    bound2 = 1.0 / jnp.sqrt(HIDDEN)
    w1 = jax.random.uniform(k1, (LATENT, HIDDEN), jnp.float32, -bound1, bound1)
    b1 = jax.random.uniform(k2, (1, HIDDEN), jnp.float32, -bound1, bound1)
    w2 = jax.random.uniform(k3, (HIDDEN, OUT), jnp.float32, -bound2, bound2)
    b2 = jax.random.uniform(k4, (1, OUT), jnp.float32, -bound2, bound2)
    return w1, b1, w2, b2


def reference_forward(z, w1, b1, w2, b2):
    h = jnp.maximum(z @ w1 + b1, 0.0)
    return jax.nn.sigmoid(h @ w2 + b2)


if __name__ == "__main__":
    key = jax.random.PRNGKey(0)
    kp, kz1, kz2 = jax.random.split(key, 3)
    w1, b1, w2, b2 = init_params(kp)

    # Small-batch path: single grid step with the whole batch in one tile.
    z_small = jax.random.normal(kz1, (16, LATENT), jnp.float32)
    out_small = jax.block_until_ready(generator_forward(z_small, w1, b1, w2, b2))
    ref_small = reference_forward(z_small, w1, b1, w2, b2)
    assert out_small.shape == (16, OUT)
    assert jnp.allclose(out_small, ref_small, atol=1e-5, rtol=1e-5), "small-batch mismatch"

    # Tiled path: 256-row tiles, 2 parallel grid steps (megacore-shardable).
    z_big = jax.random.normal(kz2, (512, LATENT), jnp.float32)
    out_big = jax.block_until_ready(generator_forward(z_big, w1, b1, w2, b2))
    ref_big = reference_forward(z_big, w1, b1, w2, b2)
    assert out_big.shape == (512, OUT)
    assert jnp.allclose(out_big, ref_big, atol=1e-5, rtol=1e-5), "tiled-batch mismatch"

    print("KERNEL_OK")
</pallas_src>

<mosaic_0001>
module attributes {stable_mosaic.version = 11 : i64} {
  func.func @generator_kernel(%arg0: i32, %arg1: memref<16x20xf32, #tpu.memory_space<vmem>>, %arg2: memref<20x512xf32, #tpu.memory_space<vmem>>, %arg3: memref<1x512xf32, #tpu.memory_space<vmem>>, %arg4: memref<512x896xf32, #tpu.memory_space<vmem>>, %arg5: memref<1x896xf32, #tpu.memory_space<vmem>>, %arg6: memref<16x896xf32, #tpu.memory_space<vmem>>) attributes {dimension_semantics = [#tpu.dimension_semantics<parallel>], iteration_bounds = array<i64: 1>, scalar_prefetch = 0 : i64, scratch_operands = 0 : i64, tpu.core_type = #tpu.core_type<tc>, window_params = [{transform_indices = @transform_0, window_bounds = array<i64: 16, 20>}, {pipeline_mode = #tpu.pipeline_mode<synchronous>, transform_indices = @transform_1, window_bounds = array<i64: 20, 512>}, {pipeline_mode = #tpu.pipeline_mode<synchronous>, transform_indices = @transform_2, window_bounds = array<i64: 1, 512>}, {pipeline_mode = #tpu.pipeline_mode<synchronous>, transform_indices = @transform_3, window_bounds = array<i64: 512, 896>}, {pipeline_mode = #tpu.pipeline_mode<synchronous>, transform_indices = @transform_4, window_bounds = array<i64: 1, 896>}, {transform_indices = @transform_5, window_bounds = array<i64: 16, 896>}]} {
    %c0 = arith.constant 0 : index
    %c0_0 = arith.constant 0 : index
    %0 = vector.load %arg1[%c0, %c0_0] : memref<16x20xf32, #tpu.memory_space<vmem>>, vector<16x20xf32>
    %c0_1 = arith.constant 0 : index
    %c0_2 = arith.constant 0 : index
    %1 = vector.load %arg2[%c0_1, %c0_2] : memref<20x512xf32, #tpu.memory_space<vmem>>, vector<20x512xf32>
    %cst = arith.constant dense<0.000000e+00> : vector<16x512xf32>
    %2 = tpu.matmul %0, %1, %cst {dimension_numbers = #tpu.dot_dimension_numbers<[1], [0], [0], [1], [0, 0, 1, 1], [], []>} : vector<16x20xf32>, vector<20x512xf32>, vector<16x512xf32> -> vector<16x512xf32>
    %c0_3 = arith.constant 0 : index
    %c0_4 = arith.constant 0 : index
    %3 = vector.load %arg3[%c0_3, %c0_4] : memref<1x512xf32, #tpu.memory_space<vmem>>, vector<1x512xf32>
    %4 = vector.broadcast %3 : vector<1x512xf32> to vector<16x512xf32>
    %5 = arith.addf %2, %4 : vector<16x512xf32>
    %cst_5 = arith.constant 0.000000e+00 : f32
    %6 = vector.broadcast %cst_5 : f32 to vector<16x512xf32>
    %7 = arith.maximumf %5, %6 : vector<16x512xf32>
    %c0_6 = arith.constant 0 : index
    %c0_7 = arith.constant 0 : index
    %8 = vector.load %arg4[%c0_6, %c0_7] : memref<512x896xf32, #tpu.memory_space<vmem>>, vector<512x896xf32>
    %cst_8 = arith.constant dense<0.000000e+00> : vector<16x896xf32>
    %9 = tpu.matmul %7, %8, %cst_8 {dimension_numbers = #tpu.dot_dimension_numbers<[1], [0], [0], [1], [0, 0, 1, 1], [], []>} : vector<16x512xf32>, vector<512x896xf32>, vector<16x896xf32> -> vector<16x896xf32>
    %c0_9 = arith.constant 0 : index
    %c0_10 = arith.constant 0 : index
    %10 = vector.load %arg5[%c0_9, %c0_10] : memref<1x896xf32, #tpu.memory_space<vmem>>, vector<1x896xf32>
    %11 = vector.broadcast %10 : vector<1x896xf32> to vector<16x896xf32>
    %12 = arith.addf %9, %11 : vector<16x896xf32>
    %cst_11 = arith.constant 0.000000e+00 : f32
    %13 = vector.broadcast %cst_11 : f32 to vector<16x896xf32>
    %14 = arith.subf %13, %12 : vector<16x896xf32>
    %15 = math.exp %14 : vector<16x896xf32>
    %cst_12 = arith.constant 1.000000e+00 : f32
    %16 = vector.broadcast %cst_12 : f32 to vector<16x896xf32>
    %17 = arith.addf %16, %15 : vector<16x896xf32>
    %18 = tpu.reciprocal %17 : vector<16x896xf32> -> vector<16x896xf32>
    %c0_13 = arith.constant 0 : index
    %c0_14 = arith.constant 0 : index
    %19 = vector.load %arg6[%c0_13, %c0_14] : memref<16x896xf32, #tpu.memory_space<vmem>>, vector<16x896xf32>
    tpu.vector_store %arg6[%c0_13, %c0_14], %18 {strides = array<i32>} : memref<16x896xf32, #tpu.memory_space<vmem>>, vector<16x896xf32>,
    return
  }
  func.func @transform_0(%arg0: i32) -> (i32, i32) {
    %c0_i32 = arith.constant 0 : i32
    %c0_i32_0 = arith.constant 0 : i32
    return %arg0, %c0_i32 : i32, i32
  }
  func.func @transform_1(%arg0: i32) -> (i32, i32) {
    %c0_i32 = arith.constant 0 : i32
    %c0_i32_0 = arith.constant 0 : i32
    %c0_i32_1 = arith.constant 0 : i32
    return %c0_i32, %c0_i32_0 : i32, i32
  }
  func.func @transform_2(%arg0: i32) -> (i32, i32) {
    %c0_i32 = arith.constant 0 : i32
    %c0_i32_0 = arith.constant 0 : i32
    %c0_i32_1 = arith.constant 0 : i32
    return %c0_i32, %c0_i32_0 : i32, i32
  }
  func.func @transform_3(%arg0: i32) -> (i32, i32) {
    %c0_i32 = arith.constant 0 : i32
    %c0_i32_0 = arith.constant 0 : i32
    %c0_i32_1 = arith.constant 0 : i32
    return %c0_i32, %c0_i32_0 : i32, i32
  }
  func.func @transform_4(%arg0: i32) -> (i32, i32) {
    %c0_i32 = arith.constant 0 : i32
    %c0_i32_0 = arith.constant 0 : i32
    %c0_i32_1 = arith.constant 0 : i32
    return %c0_i32, %c0_i32_0 : i32, i32
  }
  func.func @transform_5(%arg0: i32) -> (i32, i32) {
    %c0_i32 = arith.constant 0 : i32
    %c0_i32_0 = arith.constant 0 : i32
    return %arg0, %c0_i32 : i32, i32
  }
}

</mosaic_0001>

<bundles_post_ra>
// kernel: tpu_custom_call.1
= control target key start
LH: loop header
LB: loop body
LE: loop exit
PB: predicated region body
PF: predicated region fallthrough
CT: control target
= control target key end

     0   :  { %10 = vsyncpa [#allocation3], 0  ;;  %s2510_s0 = inlined_call_operand.hbm [shape: f32[16,20], index: 0, kind: input, shape index: {}]   ;;  %s2511_s1 = inlined_call_operand.hbm [shape: f32[20,512], index: 1, kind: input, shape index: {}]   ;;  %s2512_s2 = inlined_call_operand.hbm [shape: f32[1,512], index: 2, kind: input, shape index: {}]   ;;  %s2513_s3 = inlined_call_operand.hbm [shape: f32[512,896], index: 3, kind: input, shape index: {}]   ;;  %s2514_s4 = inlined_call_operand.hbm [shape: f32[1,896], index: 4, kind: input, shape index: {}]   ;;  %s2515_s5 = inlined_call_operand.hbm [shape: f32[16,896], index: 5, kind: output, shape index: {}]  }
   0x1   :  { %11 = vsyncpa [#allocation6], 0 }
   0x2   :  { %12 = vsyncpa [#allocation9], 0 }
   0x3   :  { %13 = vsyncpa [#allocation4], 0  ;;  %s2276_s18 = smov [#allocation5]   ;;  %s2136_s22 = scalar_lea.hbm %s2511_s1, 1536 }
   0x4   :  { %s31_s19 = sshll.u32 %s2276_s18, 4  ;;  %p2137_p0 = scmp.ne.s32.totalorder %s2511_s1, %s2136_s22  ;;  %s32_s19 = int_to_ptr.vmem [resolvable:$true] %s31_s19 }
   0x5   :  { %p2140_p1 = scmp.lt.u32.totalorder %s2136_s22, %s2511_s1 }
   0x7   :  { %p2142_p2 = pnand %p2140_p1, %p2137_p0 }
   0x9   :  { %2145 = shalt.err (!%p2142_p2)
}
   0xa   :  { %s2146_s27 = scalar_lea.vmem %s32_s19, 1536  ;;  %p2151_p4 = scmp.lt.s32.totalorder %s32_s19, %s32_s19 }
   0xb   :  { %p2147_p3 = scmp.ne.s32.totalorder %s32_s19, %s2146_s27  ;;  %p2152_p5 = scmp.lt.s32.totalorder %s2146_s27, %s2146_s27 }
   0xd   :  { %p2153_p6 = por %p2152_p5, %p2151_p4 }
   0xf   :  { %p2154_p7 = pnand %p2153_p6, %p2147_p3 }
  0x11   :  { %2157 = shalt.err (!%p2154_p7)
}
  0x12   :  { %s2277_s28 = smov 512   ;;  %s2278_s29 = smov 32  }
  0x13   :  { %37 = dma.hbm_to_vmem [thread:$0]  %s2511_s1, 1536, %s32_s19, [#allocation6], %s2277_s28, %s2277_s28, %s2278_s29  }
  0x14   :  { %s2279_s7 = smov [#allocation8]   ;;  %s2158_s11 = scalar_lea.hbm %s2513_s3, 57344 }
  0x15   :  { %s53_s8 = sshll.u32 %s2279_s7, 4  ;;  %p2159_p8 = scmp.ne.s32.totalorder %s2513_s3, %s2158_s11  ;;  %s54_s8 = int_to_ptr.vmem [resolvable:$true] %s53_s8 }
  0x16   :  { %p2162_p9 = scmp.lt.u32.totalorder %s2158_s11, %s2513_s3 }
  0x18   :  { %p2164_p10 = pnand %p2162_p9, %p2159_p8 }
  0x1a   :  { %2167 = shalt.err (!%p2164_p10)
}
  0x1b   :  { %s2168_s16 = scalar_lea.vmem %s54_s8, 57344  ;;  %p2173_p12 = scmp.lt.s32.totalorder %s54_s8, %s54_s8 }
  0x1c   :  { %p2169_p11 = scmp.ne.s32.totalorder %s54_s8, %s2168_s16  ;;  %p2174_p13 = scmp.lt.s32.totalorder %s2168_s16, %s2168_s16 }
  0x1e   :  { %p2175_p0 = por %p2174_p13, %p2173_p12 }
  0x20   :  { %p2176_p1 = pnand %p2175_p0, %p2169_p11 }
  0x22   :  { %2179 = shalt.err (!%p2176_p1)
}
  0x23   :  { %s2280_s1 = smov 896   ;;  %s2281_s17 = smov 56  }
  0x24   :  { %59 = dma.hbm_to_vmem [thread:$0]  %s2513_s3, 57344, %s54_s8, [#allocation9], %s2280_s1, %s2280_s1, %s2281_s17  }
  0x25   :  { %s2282_s20 = smov [#allocation2]   ;;  %s2180_s24 = scalar_lea.hbm %s2510_s0, 256 }
  0x26   :  { %s19_s21 = sshll.u32 %s2282_s20, 4  ;;  %p2181_p2 = scmp.ne.s32.totalorder %s2510_s0, %s2180_s24  ;;  %s20_s21 = int_to_ptr.vmem [resolvable:$true] %s19_s21 }
  0x27   :  { %p2184_p3 = scmp.lt.u32.totalorder %s2180_s24, %s2510_s0 }
  0x29   :  { %p2186_p4 = pnand %p2184_p3, %p2181_p2 }
  0x2b   :  { %2189 = shalt.err (!%p2186_p4)
}
  0x2c   :  { %s2190_s29 = scalar_lea.vmem %s20_s21, 256  ;;  %p2195_p6 = scmp.lt.s32.totalorder %s20_s21, %s20_s21 }
  0x2d   :  { %p2191_p5 = scmp.ne.s32.totalorder %s20_s21, %s2190_s29  ;;  %p2196_p7 = scmp.lt.s32.totalorder %s2190_s29, %s2190_s29 }
  0x2f   :  { %p2197_p8 = por %p2196_p7, %p2195_p6 }
  0x31   :  { %p2198_p9 = pnand %p2197_p8, %p2191_p5 }
  0x33   :  { %2201 = shalt.err (!%p2198_p9)
}
  0x34   :  { %s2283_s3 = smov 128   ;;  %s2284_s30 = smov 8  }
  0x35   :  { %25 = dma.hbm_to_vmem [thread:$0]  %s2510_s0, 256, %s20_s21, [#allocation3], %s2283_s3, %s2283_s3, %s2284_s30  }
  0x36   :  { %s2285_s8 = smov [#allocation7]   ;;  %s2286_s10 = smov [#allocation10]  }
  0x37   :  { %s44_s9 = sshll.u32 %s2285_s8, 4  ;;  %s66_s11 = sshll.u32 %s2286_s10, 4  ;;  %s45_s9 = int_to_ptr.vmem [resolvable:$true] %s44_s9  ;;  %s67_s11 = int_to_ptr.vmem [resolvable:$true] %s66_s11 }
  0x38   :  { %s2202_s14 = scalar_lea.hbm %s2512_s2, 64 }
  0x39   :  { %p2203_p10 = scmp.ne.s32.totalorder %s2512_s2, %s2202_s14  ;;  %p2206_p11 = scmp.lt.u32.totalorder %s2202_s14, %s2512_s2 }
  0x3b   :  { %p2208_p12 = pnand %p2206_p11, %p2203_p10 }
  0x3d   :  { %2211 = shalt.err (!%p2208_p12)
}
  0x3e   :  { %s2212_s0 = scalar_lea.vmem %s45_s9, 64  ;;  %p2217_p0 = scmp.lt.s32.totalorder %s45_s9, %s45_s9 }
  0x3f   :  { %p2213_p13 = scmp.ne.s32.totalorder %s45_s9, %s2212_s0  ;;  %p2218_p1 = scmp.lt.s32.totalorder %s2212_s0, %s2212_s0 }
  0x41   :  { %p2219_p2 = por %p2218_p1, %p2217_p0 }
  0x43   :  { %p2220_p3 = pnand %p2219_p2, %p2213_p13 }
  0x45   :  { %2223 = shalt.err (!%p2220_p3)
}
  0x46   :  { %47 = dma.hbm_to_vmem [thread:$0]  %s2512_s2, 64, %s45_s9, [#allocation6]  }
  0x47   :  { %s2224_s24 = scalar_lea.hbm %s2514_s4, 112 }
  0x48   :  { %p2225_p4 = scmp.ne.s32.totalorder %s2514_s4, %s2224_s24  ;;  %p2228_p5 = scmp.lt.u32.totalorder %s2224_s24, %s2514_s4 }
  0x4a   :  { %p2230_p6 = pnand %p2228_p5, %p2225_p4 }
  0x4c   :  { %2233 = shalt.err (!%p2230_p6)
}
  0x4d   :  { %s2234_s29 = scalar_lea.vmem %s67_s11, 112  ;;  %s2238_s3 = scalar_lea.vmem %s67_s11, 128 }
  0x4e   :  { %p2235_p7 = scmp.ne.s32.totalorder %s67_s11, %s2234_s29  ;;  %p2239_p8 = scmp.lt.s32.totalorder %s67_s11, %s67_s11 }
  0x4f   :  { %p2240_p9 = scmp.lt.s32.totalorder %s2238_s3, %s2234_s29 }
  0x51   :  { %p2241_p10 = por %p2240_p9, %p2239_p8 }
  0x53   :  { %p2242_p11 = pnand %p2241_p10, %p2235_p7 }
  0x55   :  { %2245 = shalt.err (!%p2242_p11)
}
  0x56   :  { %69 = dma.hbm_to_vmem [thread:$0]  %s2514_s4, 112, %s67_s11, [#allocation9]  }
  0x57   :  { %2268 = dma.done.wait [#allocation3], 256  }
  0x58   :  { %2269 = vsyncadd [#allocation3], 4294967040 }
  0x59   :  { %2270 = dma.done.wait [#allocation6], 1600  }
  0x5a   :  { %2271 = vsyncadd [#allocation6], 4294965696 }
  0x5b   :  { %2272 = dma.done.wait [#allocation9], 57456  }
  0x5c   :  { %2273 = vsyncadd [#allocation9], 4294909840  ;;  %v2287_v0 = vmov 0.0   ;;  %v88_v1 = vld [vmem:[#allocation5 + $0x8] sm:$0xff]  ;;  %v87_v3 = vld [vmem:[#allocation5] sm:$0xff]  ;;  %vm128_vm0 = vcmask 1043456  }
  0x5d   :  { %205 = vmatprep.mubr.f32.mxu1 %v2287_v0  ;;  %v92_v2 = vld [vmem:[#allocation5 + $0x28] sm:$0xff]  ;;  %v91_v5 = vld [vmem:[#allocation5 + $0x20] sm:$0xff]  ;;  %v90_v8 = vld [vmem:[#allocation5 + $0x18] sm:$0xff]  ;;  %vm121_vm1 = vcmask 162816   ;;  %s2288_s4 = smov [#allocation11]  }
  0x5e   :  { %v1587_v4 = vpack.c.bf16 %v92_v2, %v88_v1  ;;  %v1589_v6 = vpack.c.bf16 %v91_v5, %v87_v3  ;;  %v96_v7 = vld [vmem:[#allocation5 + $0x48] sm:$0xf]  ;;  %v94_v9 = vld [vmem:[#allocation5 + $0x38] sm:$0xff]  ;;  %v89_v10 = vld [vmem:[#allocation5 + $0x10] sm:$0xff]  ;;  %s1489_s6 = sshll.u32 %s2288_s4, 4  ;;  %s1490_s6 = int_to_ptr.vmem [resolvable:$true] %s1489_s6 }
  0x5f   :  { %v93_v11 = vld [vmem:[#allocation5 + $0x30] sm:$0xff]  ;;  %v95_v13 = vld [vmem:[#allocation5 + $0x40] sm:$0xf]  ;;  %v1591_v14 = vpack.c.bf16 %v94_v9, %v90_v8  ;;  %v311_v15 = vld [vmem:[#allocation8 + $0x40] sm:$0xff]  ;;  %s2246_s7 = scalar_lea.vmem %s1490_s6, 1792  ;;  %p2251_p13 = scmp.lt.s32.totalorder %s1490_s6, %s1490_s6 }
  0x60   :  { %1588 = vmatprep.subr.bf16.mxu1 %v1587_v4  ;;  %v304_v12 = vld [vmem:[#allocation8 + $0x8] sm:$0xff]  ;;  %v1593_v17 = vpack.c.bf16 %v93_v11, %v89_v10  ;;  %v303_v19 = vld [vmem:[#allocation8] sm:$0xff]  ;;  %v310_v20 = vld [vmem:[#allocation8 + $0x38] sm:$0xff]  ;;  %p2247_p12 = scmp.ne.s32.totalorder %s1490_s6, %s2246_s7  ;;  %p2252_p0 = scmp.lt.s32.totalorder %s2246_s7, %s2246_s7 }
  0x61   :  { %1590 = vmatpush1.bf16.msra.mxu1 %v1589_v6  ;;  %v85_v16 = vld [vmem:[#allocation2] sm:$0xff]  ;;  %v1595_v18 = vpack.c.bf16 %v311_v15, %v304_v12  ;;  %v98_v21 = vld [vmem:[#allocation5 + $0x58] sm:$0xf]  ;;  %v1597_v22 = vpack.c.bf16 %v310_v20, %v303_v19  ;;  %v318_v23 = vld [vmem:[#allocation8 + $0x78] sm:$0xff] }
  0x62   :  { %1503 = vmatprep.subr.msk.mxu1 %vm128_vm0, %v96_v7  ;;  %v325_v24 = vld [vmem:[#allocation8 + $0xb0] sm:$0xff]  ;;  %v306_v25 = vld [vmem:[#allocation8 + $0x18] sm:$0xff]  ;;  %v324_v30 = vld [vmem:[#allocation8 + $0xa8] sm:$0xff]  ;;  %p2253_p1 = por %p2252_p0, %p2251_p13 }
  0x63   :  { %1596 = vmatprep.subr.bf16.mxu0 %v1595_v18  ;;  %v313_v26 = vld [vmem:[#allocation8 + $0x50] sm:$0xff]  ;;  %v1599_v27 = vpack.c.bf16 %v325_v24, %v318_v23  ;;  %v97_v31 = vld [vmem:[#allocation5 + $0x50] sm:$0xf]  ;;  %v339_v33 = vld [vmem:[#allocation8 + $0x120] sm:$0xff] }
  0x64   :  { %v317_v28 = vld [vmem:[#allocation8 + $0x70] sm:$0xff]  ;;  %v332_v32 = vld [vmem:[#allocation8 + $0xe8] sm:$0xff]  ;;  %v1723_v34 = vpack.c.bf16 %v313_v26, %v306_v25  ;;  %1598 = vmatpush1.bf16.msra.mxu0 %v1597_v22  ;;  %v327_v39 = vld [vmem:[#allocation8 + $0xc0] sm:$0xff]  ;;  %p2254_p2 = pnand %p2253_p1, %p2247_p12 }
  0x65   :  { %1504 = vmatpush1.msk.msra.mxu1 %vm128_vm0, %v95_v13  ;;  %v86_v29 = vld [vmem:[#allocation2 + $0x8] sm:$0xff]  ;;  %v312_v36 = vld [vmem:[#allocation8 + $0x48] sm:$0xff]  ;;  %v1601_v38 = vpack.c.bf16 %v324_v30, %v317_v28  ;;  %1600 = vmatprep.subr.bf16.mxu0 %v1599_v27  ;;  %v1603_v40 = vpack.c.bf16 %v339_v33, %v332_v32  ;;  %v331_v41 = vld [vmem:[#allocation8 + $0xe0] sm:$0xff] }
  0x66   :  { %1505 = vmatmul.mubr.msk.f32.vlgmr.msra.gmra.mrb[0].mxu1 %vm121_vm1, %v85_v16  ;;  %1592 = vmatprep.subr.bf16.mxu1 %v1591_v14  ;;  %v305_v35 = vld [vmem:[#allocation8 + $0x10] sm:$0xff]  ;;  %v320_v37 = vld [vmem:[#allocation8 + $0x88] sm:$0xff]  ;;  %v338_v42 = vld [vmem:[#allocation8 + $0x118] sm:$0xff] }
  0x67   :  { %1594 = vmatpush1.bf16.msra.mxu1 %v1593_v17  ;;  %211 = vmatprep.mubr.f32.mxu1 %v2287_v0  ;;  %v346_v43 = vld [vmem:[#allocation8 + $0x158] sm:$0xff]  ;;  %v353_v44 = vld [vmem:[#allocation8 + $0x190] sm:$0xff]  ;;  %v1725_v45 = vpack.c.bf16 %v312_v36, %v305_v35  ;;  %v1727_v46 = vpack.c.bf16 %v327_v39, %v320_v37  ;;  %v319_v47 = vld [vmem:[#allocation8 + $0x80] sm:$0xff]  ;;  %v1605_v50 = vpack.c.bf16 %v338_v42, %v331_v41 }
  0x68   :  { %1507 = vmatprep.subr.msk.mxu1 %vm128_vm0, %v98_v21  ;;  %1602 = vmatpush1.bf16.msra.mxu0 %v1601_v38  ;;  %v326_v48 = vld [vmem:[#allocation8 + $0xb8] sm:$0xff]  ;;  %v341_v51 = vld [vmem:[#allocation8 + $0x130] sm:$0xff]  ;;  %v1607_v52 = vpack.c.bf16 %v353_v44, %v346_v43  ;;  %v352_v54 = vld [vmem:[#allocation8 + $0x188] sm:$0xff] }
  0x69   :  { %v334_v49 = vld [vmem:[#allocation8 + $0xf8] sm:$0xff]  ;;  %1604 = vmatprep.subr.bf16.mxu0 %v1603_v40  ;;  %v345_v53 = vld [vmem:[#allocation8 + $0x150] sm:$0xff]  ;;  %v360_v55 = vld [vmem:[#allocation8 + $0x1c8] sm:$0xff]  ;;  %v1729_v57 = vpack.c.bf16 %v326_v48, %v319_v47 }
  0x6a   :  { %1506 = vmatmul.mubr.msk.f32.gmra.mrb[2].mxu1 %vm121_vm1, %v86_v29  ;;  %v367_v56 = vld [vmem:[#allocation8 + $0x200] sm:$0xff]  ;;  %v1731_v58 = vpack.c.bf16 %v341_v51, %v334_v49  ;;  %v333_v59 = vld [vmem:[#allocation8 + $0xf0] sm:$0xff]  ;;  %v340_v60 = vld [vmem:[#allocation8 + $0x128] sm:$0xff]  ;;  %v1609_v62 = vpack.c.bf16 %v352_v54, %v345_v53 }
  0x6b   :  { %1508 = vmatpush1.msk.msra.mxu1 %vm128_vm0, %v97_v31  ;;  %282 = vmatprep.mubr.f32.mxu1 %v2287_v0  ;;  %v348_v61 = vld [vmem:[#allocation8 + $0x168] sm:$0xff]  ;;  %v355_v63 = vld [vmem:[#allocation8 + $0x1a0] sm:$0xff]  ;;  %v1611_v1 = vpack.c.bf16 %v367_v56, %v360_v55  ;;  %v366_v3 = vld [vmem:[#allocation8 + $0x1f8] sm:$0xff] }
  0x6c   :  { %1724 = vmatprep.subr.bf16.mxu1 %v1723_v34  ;;  %1606 = vmatpush1.bf16.msra.mxu0 %v1605_v50  ;;  %v359_v2 = vld [vmem:[#allocation8 + $0x1c0] sm:$0xff]  ;;  %v374_v4 = vld [vmem:[#allocation8 + $0x238] sm:$0xff]  ;;  %v381_v5 = vld [vmem:[#allocation8 + $0x270] sm:$0xff]  ;;  %v1735_v6 = vpack.c.bf16 %v355_v63, %v348_v61 }
  0x6d   :  { %1608 = vmatprep.subr.bf16.mxu0 %v1607_v52  ;;  %v347_v7 = vld [vmem:[#allocation8 + $0x160] sm:$0xff]  ;;  %v354_v8 = vld [vmem:[#allocation8 + $0x198] sm:$0xff]  ;;  %v1613_v10 = vpack.c.bf16 %v366_v3, %v359_v2  ;;  %v369_v11 = vld [vmem:[#allocation8 + $0x210] sm:$0xff]  ;;  %v1615_v12 = vpack.c.bf16 %v381_v5, %v374_v4 }
  0x6e   :  { %1509 = vmatmul.mubr.msk.f32.vlgmr.msra.gmra.mrb[4].mxu1 %vm121_vm1, %v85_v16  ;;  %v362_v9 = vld [vmem:[#allocation8 + $0x1d8] sm:$0xff]  ;;  %v373_v13 = vld [vmem:[#allocation8 + $0x230] sm:$0xff]  ;;  %v380_v14 = vld [vmem:[#allocation8 + $0x268] sm:$0xff]  ;;  %v1737_v17 = vpack.c.bf16 %v354_v8, %v347_v7 }
  0x6f   :  { %288 = vmatprep.mubr.f32.mxu1 %v2287_v0  ;;  %1726 = vmatpush1.bf16.msra.mxu1 %v1725_v45  ;;  %v1733_v0 = vpack.c.bf16 %v340_v60, %v333_v59  ;;  %v388_v15 = vld [vmem:[#allocation8 + $0x2a8] sm:$0xff]  ;;  %v395_v16 = vld [vmem:[#allocation8 + $0x2e0] sm:$0xff]  ;;  %v1739_v18 = vpack.c.bf16 %v369_v11, %v362_v9  ;;  %v361_v19 = vld [vmem:[#allocation8 + $0x1d0] sm:$0xff]  ;;  %v1617_v22 = vpack.c.bf16 %v380_v14, %v373_v13 }
  0x70   :  { %1728 = vmatprep.subr.bf16.mxu1 %v1727_v46  ;;  %1610 = vmatpush1.bf16.msra.mxu0 %v1609_v62  ;;  %v368_v20 = vld [vmem:[#allocation8 + $0x208] sm:$0xff]  ;;  %v383_v23 = vld [vmem:[#allocation8 + $0x280] sm:$0xff]  ;;  %v1619_v24 = vpack.c.bf16 %v395_v16, %v388_v15  ;;  %v394_v26 = vld [vmem:[#allocation8 + $0x2d8] sm:$0xff] }
  0x71   :  { %1612 = vmatprep.subr.bf16.mxu0 %v1611_v1  ;;  %v376_v21 = vld [vmem:[#allocation8 + $0x248] sm:$0xff]  ;;  %v387_v25 = vld [vmem:[#allocation8 + $0x2a0] sm:$0xff]  ;;  %v402_v27 = vld [vmem:[#allocation8 + $0x318] sm:$0xff] }
  0x72   :  { %1510 = vmatmul.mubr.msk.f32.gmra.mrb[6].mxu1 %vm121_vm1, %v86_v29  ;;  %v409_v28 = vld [vmem:[#allocation8 + $0x350] sm:$0xff]  ;;  %v1741_v29 = vpack.c.bf16 %v368_v20, %v361_v19  ;;  %v1743_v30 = vpack.c.bf16 %v383_v23, %v376_v21  ;;  %v375_v31 = vld [vmem:[#allocation8 + $0x240] sm:$0xff]  ;;  %v382_v32 = vld [vmem:[#allocation8 + $0x278] sm:$0xff]  ;;  %v1621_v34 = vpack.c.bf16 %v394_v26, %v387_v25 }
  0x73   :  { %1730 = vmatpush1.bf16.msra.mxu1 %v1729_v57  ;;  %v390_v33 = vld [vmem:[#allocation8 + $0x2b8] sm:$0xff]  ;;  %v397_v35 = vld [vmem:[#allocation8 + $0x2f0] sm:$0xff]  ;;  %v1623_v36 = vpack.c.bf16 %v409_v28, %v402_v27  ;;  %v408_v38 = vld [vmem:[#allocation8 + $0x348] sm:$0xff]  ;;  %v1745_v41 = vpack.c.bf16 %v382_v32, %v375_v31 }
  0x74   :  { %1732 = vmatprep.subr.bf16.mxu1 %v1731_v58  ;;  %1614 = vmatpush1.bf16.msra.mxu0 %v1613_v10  ;;  %v401_v37 = vld [vmem:[#allocation8 + $0x310] sm:$0xff]  ;;  %v416_v39 = vld [vmem:[#allocation8 + $0x388] sm:$0xff]  ;;  %v423_v40 = vld [vmem:[#allocation8 + $0x3c0] sm:$0xff]  ;;  %v1747_v42 = vpack.c.bf16 %v397_v35, %v390_v33 }
  0x75   :  { %1616 = vmatprep.subr.bf16.mxu0 %v1615_v12  ;;  %v389_v43 = vld [vmem:[#allocation8 + $0x2b0] sm:$0xff]  ;;  %v396_v44 = vld [vmem:[#allocation8 + $0x2e8] sm:$0xff]  ;;  %v1625_v46 = vpack.c.bf16 %v408_v38, %v401_v37  ;;  %v411_v47 = vld [vmem:[#allocation8 + $0x360] sm:$0xff]  ;;  %v1627_v48 = vpack.c.bf16 %v423_v40, %v416_v39 }
  0x76   :  { %v404_v45 = vld [vmem:[#allocation8 + $0x328] sm:$0xff]  ;;  %v415_v49 = vld [vmem:[#allocation8 + $0x380] sm:$0xff]  ;;  %v422_v50 = vld [vmem:[#allocation8 + $0x3b8] sm:$0xff]  ;;  %v1749_v53 = vpack.c.bf16 %v396_v44, %v389_v43 }
  0x77   :  { %1734 = vmatpush1.bf16.msra.mxu1 %v1733_v0  ;;  %v430_v51 = vld [vmem:[#allocation8 + $0x3f8] sm:$0xff]  ;;  %v437_v52 = vld [vmem:[#allocation8 + $0x430] sm:$0xff]  ;;  %v1751_v54 = vpack.c.bf16 %v411_v47, %v404_v45  ;;  %v403_v55 = vld [vmem:[#allocation8 + $0x320] sm:$0xff]  ;;  %v1629_v58 = vpack.c.bf16 %v422_v50, %v415_v49 }
  0x78   :  { %1736 = vmatprep.subr.bf16.mxu1 %v1735_v6  ;;  %1618 = vmatpush1.bf16.msra.mxu0 %v1617_v22  ;;  %v410_v56 = vld [vmem:[#allocation8 + $0x358] sm:$0xff]  ;;  %v425_v59 = vld [vmem:[#allocation8 + $0x3d0] sm:$0xff]  ;;  %v1631_v60 = vpack.c.bf16 %v437_v52, %v430_v51  ;;  %v436_v62 = vld [vmem:[#allocation8 + $0x428] sm:$0xff] }
  0x79   :  { %1620 = vmatprep.subr.bf16.mxu0 %v1619_v24  ;;  %v418_v57 = vld [vmem:[#allocation8 + $0x398] sm:$0xff]  ;;  %v429_v61 = vld [vmem:[#allocation8 + $0x3f0] sm:$0xff]  ;;  %v444_v63 = vld [vmem:[#allocation8 + $0x468] sm:$0xff]  ;;  %v1753_v2 = vpack.c.bf16 %v410_v56, %v403_v55 }
  0x7a   :  { %v451_v1 = vld [vmem:[#allocation8 + $0x4a0] sm:$0xff]  ;;  %v1755_v3 = vpack.c.bf16 %v425_v59, %v418_v57  ;;  %v417_v4 = vld [vmem:[#allocation8 + $0x390] sm:$0xff]  ;;  %v424_v5 = vld [vmem:[#allocation8 + $0x3c8] sm:$0xff]  ;;  %v1633_v6 = vpack.c.bf16 %v436_v62, %v429_v61 }
  0x7b   :  { %1738 = vmatpush1.bf16.msra.mxu1 %v1737_v17  ;;  %v432_v0 = vld [vmem:[#allocation8 + $0x408] sm:$0xff]  ;;  %v439_v7 = vld [vmem:[#allocation8 + $0x440] sm:$0xff]  ;;  %v1635_v8 = vpack.c.bf16 %v451_v1, %v444_v63  ;;  %v450_v10 = vld [vmem:[#allocation8 + $0x498] sm:$0xff]  ;;  %v1757_v13 = vpack.c.bf16 %v424_v5, %v417_v4 }
  0x7c   :  { %1740 = vmatprep.subr.bf16.mxu1 %v1739_v18  ;;  %1622 = vmatpush1.bf16.msra.mxu0 %v1621_v34  ;;  %v443_v9 = vld [vmem:[#allocation8 + $0x460] sm:$0xff]  ;;  %v458_v11 = vld [vmem:[#allocation8 + $0x4d8] sm:$0xff]  ;;  %v465_v12 = vld [vmem:[#allocation8 + $0x510] sm:$0xff]  ;;  %v1759_v14 = vpack.c.bf16 %v439_v7, %v432_v0 }
  0x7d   :  { %1624 = vmatprep.subr.bf16.mxu0 %v1623_v36  ;;  %v431_v15 = vld [vmem:[#allocation8 + $0x400] sm:$0xff]  ;;  %v438_v16 = vld [vmem:[#allocation8 + $0x438] sm:$0xff]  ;;  %v1637_v18 = vpack.c.bf16 %v450_v10, %v443_v9  ;;  %v453_v19 = vld [vmem:[#allocation8 + $0x4b0] sm:$0xff]  ;;  %v1639_v20 = vpack.c.bf16 %v465_v12, %v458_v11 }
  0x7e   :  { %v446_v17 = vld [vmem:[#allocation8 + $0x478] sm:$0xff]  ;;  %v457_v21 = vld [vmem:[#allocation8 + $0x4d0] sm:$0xff]  ;;  %v464_v22 = vld [vmem:[#allocation8 + $0x508] sm:$0xff]  ;;  %v1761_v25 = vpack.c.bf16 %v438_v16, %v431_v15 }
  0x7f   :  { %1742 = vmatpush1.bf16.msra.mxu1 %v1741_v29  ;;  %v472_v23 = vld [vmem:[#allocation8 + $0x548] sm:$0xff]  ;;  %v479_v24 = vld [vmem:[#allocation8 + $0x580] sm:$0xff]  ;;  %v1763_v26 = vpack.c.bf16 %v453_v19, %v446_v17  ;;  %v445_v27 = vld [vmem:[#allocation8 + $0x470] sm:$0xff] }
  0x80   :  { %1744 = vmatprep.subr.bf16.mxu1 %v1743_v30  ;;  %1626 = vmatpush1.bf16.msra.mxu0 %v1625_v46  ;;  %v452_v28 = vld [vmem:[#allocation8 + $0x4a8] sm:$0xff]  ;;  %v1641_v30 = vpack.c.bf16 %v464_v22, %v457_v21  ;;  %v467_v31 = vld [vmem:[#allocation8 + $0x520] sm:$0xff]  ;;  %v1643_v32 = vpack.c.bf16 %v479_v24, %v472_v23  ;;  %v478_v34 = vld [vmem:[#allocation8 + $0x578] sm:$0xff] }
  0x81   :  { %1628 = vmatprep.subr.bf16.mxu0 %v1627_v48  ;;  %v460_v29 = vld [vmem:[#allocation8 + $0x4e8] sm:$0xff]  ;;  %v471_v33 = vld [vmem:[#allocation8 + $0x540] sm:$0xff]  ;;  %v486_v35 = vld [vmem:[#allocation8 + $0x5b8] sm:$0xff]  ;;  %v1765_v37 = vpack.c.bf16 %v452_v28, %v445_v27 }
  0x82   :  { %v493_v36 = vld [vmem:[#allocation8 + $0x5f0] sm:$0xff]  ;;  %v1767_v38 = vpack.c.bf16 %v467_v31, %v460_v29  ;;  %v459_v39 = vld [vmem:[#allocation8 + $0x4e0] sm:$0xff]  ;;  %v466_v40 = vld [vmem:[#allocation8 + $0x518] sm:$0xff] }
  0x83   :  { %1746 = vmatpush1.bf16.msra.mxu1 %v1745_v41  ;;  %v474_v41 = vld [vmem:[#allocation8 + $0x558] sm:$0xff]  ;;  %v481_v43 = vld [vmem:[#allocation8 + $0x590] sm:$0xff]  ;;  %v1647_v44 = vpack.c.bf16 %v493_v36, %v486_v35  ;;  %v492_v46 = vld [vmem:[#allocation8 + $0x5e8] sm:$0xff]  ;;  %v1769_v49 = vpack.c.bf16 %v466_v40, %v459_v39 }
  0x84   :  { %1748 = vmatprep.subr.bf16.mxu1 %v1747_v42  ;;  %1630 = vmatpush1.bf16.msra.mxu0 %v1629_v58  ;;  %v1645_v42 = vpack.c.bf16 %v478_v34, %v471_v33  ;;  %v485_v45 = vld [vmem:[#allocation8 + $0x5b0] sm:$0xff]  ;;  %v500_v47 = vld [vmem:[#allocation8 + $0x628] sm:$0xff]  ;;  %v507_v48 = vld [vmem:[#allocation8 + $0x660] sm:$0xff]  ;;  %v1771_v50 = vpack.c.bf16 %v481_v43, %v474_v41 }
  0x85   :  { %1632 = vmatprep.subr.bf16.mxu0 %v1631_v60  ;;  %v473_v51 = vld [vmem:[#allocation8 + $0x550] sm:$0xff]  ;;  %v480_v52 = vld [vmem:[#allocation8 + $0x588] sm:$0xff]  ;;  %v495_v55 = vld [vmem:[#allocation8 + $0x600] sm:$0xff]  ;;  %v1651_v56 = vpack.c.bf16 %v507_v48, %v500_v47 }
  0x86   :  { %v499_v57 = vld [vmem:[#allocation8 + $0x620] sm:$0xff]  ;;  %v506_v58 = vld [vmem:[#allocation8 + $0x658] sm:$0xff]  ;;  %v1773_v59 = vpack.c.bf16 %v480_v52, %v473_v51  ;;  %v501_v5 = vld [vmem:[#allocation8 + $0x630] sm:$0xff] }
  0x87   :  { %1750 = vmatpush1.bf16.msra.mxu1 %v1749_v53  ;;  %v488_v53 = vld [vmem:[#allocation8 + $0x5c8] sm:$0xff]  ;;  %v487_v61 = vld [vmem:[#allocation8 + $0x5c0] sm:$0xff]  ;;  %v494_v62 = vld [vmem:[#allocation8 + $0x5f8] sm:$0xff]  ;;  %v1653_v63 = vpack.c.bf16 %v506_v58, %v499_v57 }
  0x88   :  { %1752 = vmatprep.subr.bf16.mxu1 %v1751_v54  ;;  %1634 = vmatpush1.bf16.msra.mxu0 %v1633_v6  ;;  %v1649_v54 = vpack.c.bf16 %v492_v46, %v485_v45  ;;  %v1775_v60 = vpack.c.bf16 %v495_v55, %v488_v53  ;;  %v502_v1 = vld [vmem:[#allocation8 + $0x638] sm:$0xff]  ;;  %v508_v0 = vld [vmem:[#allocation8 + $0x668] sm:$0xff]  ;;  %v523_v11 = vld [vmem:[#allocation8 + $0x6e0] sm:$0xff] }
  0x89   :  { %1636 = vmatprep.subr.bf16.mxu0 %v1635_v8  ;;  %v1781_v6 = vpack.c.bf16 %v508_v0, %v501_v5  ;;  %v514_v7 = vld [vmem:[#allocation8 + $0x698] sm:$0xff]  ;;  %v521_v8 = vld [vmem:[#allocation8 + $0x6d0] sm:$0xff]  ;;  %v516_v9 = vld [vmem:[#allocation8 + $0x6a8] sm:$0xff] }
  0x8a   :  { %v1655_v10 = vpack.c.bf16 %v521_v8, %v514_v7  ;;  %v513_v12 = vld [vmem:[#allocation8 + $0x690] sm:$0xff]  ;;  %v515_v16 = vld [vmem:[#allocation8 + $0x6a0] sm:$0xff]  ;;  %v522_v17 = vld [vmem:[#allocation8 + $0x6d8] sm:$0xff] }
  0x8b   :  { %1754 = vmatpush1.bf16.msra.mxu1 %v1753_v2  ;;  %v509_v2 = vld [vmem:[#allocation8 + $0x670] sm:$0xff]  ;;  %v528_v19 = vld [vmem:[#allocation8 + $0x708] sm:$0xff]  ;;  %v530_v21 = vld [vmem:[#allocation8 + $0x718] sm:$0xff] }
  0x8c   :  { %1756 = vmatprep.subr.bf16.mxu1 %v1755_v3  ;;  %1638 = vmatpush1.bf16.msra.mxu0 %v1637_v18  ;;  %v1777_v3 = vpack.c.bf16 %v494_v62, %v487_v61  ;;  %v1779_v4 = vpack.c.bf16 %v509_v2, %v502_v1  ;;  %v1785_v18 = vpack.c.bf16 %v522_v17, %v515_v16  ;;  %v537_v23 = vld [vmem:[#allocation8 + $0x750] sm:$0xff]  ;;  %v2397_v28 = vld [vmem:[#allocation7] sm:$0xf]  ;;  %v527_v33 = vld [vmem:[#allocation8 + $0x700] sm:$0xff] }
  0x8d   :  { %1640 = vmatprep.subr.bf16.mxu0 %v1639_v20  ;;  %v535_v20 = vld [vmem:[#allocation8 + $0x740] sm:$0xff]  ;;  %v1787_v24 = vpack.c.bf16 %v537_v23, %v530_v21  ;;  %v534_v34 = vld [vmem:[#allocation8 + $0x738] sm:$0xff]  ;;  %v549_v41 = vld [vmem:[#allocation8 + $0x7b0] sm:$0xff] }
  0x8e   :  { %v1659_v22 = vpack.c.bf16 %v535_v20, %v528_v19  ;;  %v542_v39 = vld [vmem:[#allocation8 + $0x778] sm:$0xff]  ;;  %v551_v43 = vld [vmem:[#allocation8 + $0x7c0] sm:$0xff]  ;;  %v1661_v46 = vpack.c.bf16 %v534_v34, %v527_v33  ;;  %v541_v48 = vld [vmem:[#allocation8 + $0x770] sm:$0xff] }
  0x8f   :  { %1758 = vmatpush1.bf16.msra.mxu1 %v1757_v13  ;;  %v520_v13 = vld [vmem:[#allocation8 + $0x6c8] sm:$0xff]  ;;  %v1663_v52 = vpack.c.bf16 %v549_v41, %v542_v39  ;;  %v550_v55 = vld [vmem:[#allocation8 + $0x7b8] sm:$0xff]  ;;  %v565_v61 = vld [vmem:[#allocation8 + $0x830] sm:$0xff] }
  0x90   :  { %1760 = vmatprep.subr.bf16.mxu1 %v1759_v14  ;;  %1642 = vmatpush1.bf16.msra.mxu0 %v1641_v30  ;;  %v1783_v14 = vpack.c.bf16 %v523_v11, %v516_v9  ;;  %v1657_v15 = vpack.c.bf16 %v520_v13, %v513_v12  ;;  %v562_v5 = vld [vmem:[#allocation8 + $0x818] sm:$0xff]  ;;  %v557_v9 = vld [vmem:[#allocation8 + $0x7f0] sm:$0xff]  ;;  %v576_v20 = vld [vmem:[#allocation8 + $0x888] sm:$0xff] }
  0x91   :  { %1644 = vmatprep.subr.bf16.mxu0 %v1643_v32  ;;  %v570_v11 = vld [vmem:[#allocation8 + $0x858] sm:$0xff]  ;;  %v577_v13 = vld [vmem:[#allocation8 + $0x890] sm:$0xff]  ;;  %v591_v33 = vld [vmem:[#allocation8 + $0x900] sm:$0xff] }
  0x92   :  { %v569_v19 = vld [vmem:[#allocation8 + $0x850] sm:$0xff]  ;;  %v1671_v23 = vpack.c.bf16 %v577_v13, %v570_v11  ;;  %v586_v34 = vld [vmem:[#allocation8 + $0x8d8] sm:$0xff]  ;;  %v628_v13 = vld [vmem:[#allocation8 + $0xa28] sm:$0xff] }
  0x93   :  { %1762 = vmatpush1.bf16.msra.mxu1 %v1761_v25  ;;  %v101_v25 = vlaneseq  ;;  %v590_v39 = vld [vmem:[#allocation8 + $0x8f8] sm:$0xff] }
  0x94   :  { %1764 = vmatprep.subr.bf16.mxu1 %v1763_v26  ;;  %1646 = vmatpush1.bf16.msra.mxu0 %v1645_v42  ;;  %v544_v42 = vld [vmem:[#allocation8 + $0x788] sm:$0xff]  ;;  %v626_v11 = vld [vmem:[#allocation8 + $0xa18] sm:$0xff] }
  0x95   :  { %1648 = vmatprep.subr.bf16.mxu0 %v1647_v44  ;;  %v2394_v26 = vshrl.u32 %v101_v25, 7  ;;  %v1791_v53 = vpack.c.bf16 %v551_v43, %v544_v42  ;;  %v571_v25 = vld [vmem:[#allocation8 + $0x860] sm:$0xff]  ;;  %v585_v42 = vld [vmem:[#allocation8 + $0x8d0] sm:$0xff]  ;;  %v592_v43 = vld [vmem:[#allocation8 + $0x908] sm:$0xff] }
  0x97   :  { %1766 = vmatpush1.bf16.msra.mxu1 %v1765_v37  ;;  %v103_v27 = vsub.s32 0, %v2394_v26  ;;  %v107_v29 = vsub.s32 1, %v2394_v26  ;;  %v529_v37 = vld [vmem:[#allocation8 + $0x710] sm:$0xff]  ;;  %v115_v44 = vsub.s32 3, %v2394_v26 }
  0x98   :  { %1768 = vmatprep.subr.bf16.mxu1 %v1767_v38  ;;  %1650 = vmatpush1.bf16.msra.mxu0 %v1649_v54  ;;  %v536_v38 = vld [vmem:[#allocation8 + $0x748] sm:$0xff]  ;;  %v543_v54 = vld [vmem:[#allocation8 + $0x780] sm:$0xff] }
  0x99   :  { %1652 = vmatprep.subr.bf16.mxu0 %v1651_v56  ;;  %v104_v30 = vrot.slane %v2397_v28, %v103_v27  ;;  %v108_v31 = vrot.slane %v2397_v28, %v107_v29  ;;  %v1789_v47 = vpack.c.bf16 %v536_v38, %v529_v37  ;;  %v556_v56 = vld [vmem:[#allocation8 + $0x7e8] sm:$0xff]  ;;  %v583_v38 = vld [vmem:[#allocation8 + $0x8c0] sm:$0xff] }
  0x9b   :  { %1770 = vmatpush1.bf16.msra.mxu1 %v1769_v49  ;;  %v548_v49 = vld [vmem:[#allocation8 + $0x7a8] sm:$0xff] }
  0x9c   :  { %1772 = vmatprep.subr.bf16.mxu1 %v1771_v50  ;;  %1654 = vmatpush1.bf16.msra.mxu0 %v1653_v63  ;;  %v2416_v63 = vrot.slane %v2397_v28, %v115_v44  ;;  %v1665_v2 = vpack.c.bf16 %v548_v49, %v541_v48  ;;  %v600_v48 = vld [vmem:[#allocation8 + $0x948] sm:$0xff]  ;;  %v607_v49 = vld [vmem:[#allocation8 + $0x980] sm:$0xff] }
  0x9d   :  { %1656 = vmatprep.subr.bf16.mxu0 %v1655_v10  ;;  %v564_v10 = vld [vmem:[#allocation8 + $0x828] sm:$0xff] }
  0x9f   :  { %1774 = vmatpush1.bf16.msra.mxu1 %v1773_v59  ;;  %v563_v59 = vld [vmem:[#allocation8 + $0x820] sm:$0xff] }
  0xa0   :  { %1776 = vmatprep.subr.bf16.mxu1 %v1775_v60  ;;  %1658 = vmatpush1.bf16.msra.mxu0 %v1657_v15  ;;  %v558_v60 = vld [vmem:[#allocation8 + $0x7f8] sm:$0xff]  ;;  %v1667_v7 = vpack.c.bf16 %v563_v59, %v556_v56  ;;  %v579_v15 = vld [vmem:[#allocation8 + $0x8a0] sm:$0xff]  ;;  %v1807_v56 = vpack.c.bf16 %v607_v49, %v600_v48  ;;  %v612_v59 = vld [vmem:[#allocation8 + $0x9a8] sm:$0xff] }
  0xa1   :  { %1660 = vmatprep.subr.bf16.mxu0 %v1659_v22  ;;  %v1795_v8 = vpack.c.bf16 %v565_v61, %v558_v60  ;;  %v619_v60 = vld [vmem:[#allocation8 + $0x9e0] sm:$0xff]  ;;  %v614_v61 = vld [vmem:[#allocation8 + $0x9b8] sm:$0xff] }
  0xa3   :  { %1778 = vmatpush1.bf16.msra.mxu1 %v1777_v3  ;;  %v1793_v3 = vpack.c.bf16 %v550_v55, %v543_v54  ;;  %v604_v54 = vld [vmem:[#allocation8 + $0x968] sm:$0xff] }
  0xa4   :  { %1780 = vmatprep.subr.bf16.mxu1 %v1779_v4  ;;  %v555_v4 = vld [vmem:[#allocation8 + $0x7e0] sm:$0xff] }
  0xa5   :  { %v1669_v17 = vpack.c.bf16 %v562_v5, %v555_v4  ;;  %v611_v4 = vld [vmem:[#allocation8 + $0x9a0] sm:$0xff]  ;;  %v618_v5 = vld [vmem:[#allocation8 + $0x9d8] sm:$0xff] }
  0xa7   :  { %1782 = vmatpush1.bf16.msra.mxu1 %v1781_v6 }
  0xa8   :  { %1784 = vmatprep.subr.bf16.mxu1 %v1783_v14  ;;  %v572_v14 = vld [vmem:[#allocation8 + $0x868] sm:$0xff] }
  0xab   :  { %1786 = vmatpush1.bf16.msra.mxu1 %v1785_v18  ;;  %v1797_v18 = vpack.c.bf16 %v564_v10, %v557_v9  ;;  %v613_v9 = vld [vmem:[#allocation8 + $0x9b0] sm:$0xff]  ;;  %v620_v10 = vld [vmem:[#allocation8 + $0x9e8] sm:$0xff] }
  0xac   :  { %1788 = vmatprep.subr.bf16.mxu1 %v1787_v24  ;;  %v1799_v24 = vpack.c.bf16 %v579_v15, %v572_v14  ;;  %v635_v14 = vld [vmem:[#allocation8 + $0xa60] sm:$0xff]  ;;  %v1685_v15 = vpack.c.bf16 %v618_v5, %v611_v4 }
 0x139   :  { %v207_v32 = vpop.f32.mrb[0].mxu1 }
 0x13a   :  { %v208_v35 = vadd.f32 %v207_v32, %v104_v30  ;;  %v209_v36 = vpop.f32.mrb[1].mxu1 }
 0x13b   :  { %v210_v40 = vadd.f32 %v209_v36, %v108_v31  ;;  %v1673_v36 = vpack.c.bf16 %v576_v20, %v569_v19  ;;  %v1815_v20 = vpack.c.bf16 %v635_v14, %v628_v13 }
 0x13c   :  { %v2409_v51 = vmax.f32 %v208_v35, 0.0  ;;  %v593_v35 = vld [vmem:[#allocation8 + $0x910] sm:$0xff] }
 0x13d   :  { %v2407_v45 = vmax.f32 %v210_v40, 0.0  ;;  %v213_v50 = vpop.f32.mrb[2].mxu1  ;;  %v1803_v41 = vpack.c.bf16 %v593_v35, %v586_v34 }
 0x13e   :  { %v214_v57 = vadd.f32 %v213_v50, %v104_v30  ;;  %v215_v58 = vpop.f32.mrb[3].mxu1  ;;  %v578_v30 = vld [vmem:[#allocation8 + $0x898] sm:$0xff]  ;;  %v1677_v50 = vpack.c.bf16 %v590_v39, %v583_v38 }
 0x13f   :  { %852 = vmatprep.mubr.f32.mxu0 %v2407_v45  ;;  %1006 = vmatprep.mubr.f32.mxu1 %v2407_v45  ;;  %v216_v62 = vadd.f32 %v215_v58, %v108_v31  ;;  %v584_v31 = vld [vmem:[#allocation8 + $0x8c8] sm:$0xff]  ;;  %v1801_v37 = vpack.c.bf16 %v578_v30, %v571_v25  ;;  %v606_v58 = vld [vmem:[#allocation8 + $0x978] sm:$0xff]  ;;  %v647_v30 = vld [vmem:[#allocation8 + $0xac0] sm:$0xff] }
 0x140   :  { %853 = vmatmul.mubr.f32.vlgmr.msra.gmra.mrb[0].mxu0 %v2409_v51  ;;  %1007 = vmatmul.mubr.f32.vlgmr.msra.gmra.mrb[8].mxu1 %v2409_v51  ;;  %v2420_v1 = vmax.f32 %v214_v57, 0.0  ;;  %v1675_v40 = vpack.c.bf16 %v591_v33, %v584_v31  ;;  %v599_v57 = vld [vmem:[#allocation8 + $0x940] sm:$0xff]  ;;  %v640_v25 = vld [vmem:[#allocation8 + $0xa88] sm:$0xff]  ;;  %v642_v31 = vld [vmem:[#allocation8 + $0xa98] sm:$0xff] }
 0x141   :  { %1662 = vmatpush1.bf16.msra.mxu0 %v1661_v46  ;;  %1790 = vmatpush1.bf16.msra.mxu1 %v1789_v47  ;;  %v2422_v0 = vmax.f32 %v216_v62, 0.0  ;;  %v2424_v6 = vpop.f32.mrb[4].mxu1  ;;  %v598_v46 = vld [vmem:[#allocation8 + $0x938] sm:$0xff]  ;;  %v605_v47 = vld [vmem:[#allocation8 + $0x970] sm:$0xff]  ;;  %v1691_v38 = vpack.c.bf16 %v647_v30, %v640_v25 }
 0x142   :  { %1664 = vmatprep.subr.bf16.mxu0 %v1663_v52  ;;  %1792 = vmatprep.subr.bf16.mxu1 %v1791_v53  ;;  %v286_v12 = vpop.f32.mrb[5].mxu1  ;;  %v1805_v52 = vpack.c.bf16 %v592_v43, %v585_v42  ;;  %v597_v53 = vld [vmem:[#allocation8 + $0x930] sm:$0xff]  ;;  %v1679_v55 = vpack.c.bf16 %v605_v47, %v598_v46  ;;  %v654_v42 = vld [vmem:[#allocation8 + $0xaf8] sm:$0xff]  ;;  %v656_v46 = vld [vmem:[#allocation8 + $0xb08] sm:$0xff] }
 0x143   :  { %v287_v16 = vadd.f32 %v286_v12, %v2416_v63  ;;  %858 = vmatprep.mubr.f32.mxu0 %v2422_v0  ;;  %1012 = vmatprep.mubr.f32.mxu1 %v2422_v0  ;;  %v621_v62 = vld [vmem:[#allocation8 + $0x9f0] sm:$0xff]  ;;  %v663_v47 = vld [vmem:[#allocation8 + $0xb40] sm:$0xff]  ;;  %v698_v25 = vld [vmem:[#allocation8 + $0xc58] sm:$0xff] }
 0x144   :  { %859 = vmatmul.mubr.f32.gmra.mrb[2].mxu0 %v2420_v1  ;;  %1013 = vmatmul.mubr.f32.gmra.mrb[10].mxu1 %v2420_v1  ;;  %v633_v12 = vld [vmem:[#allocation8 + $0xa50] sm:$0xff] }
 0x145   :  { %1666 = vmatpush1.bf16.msra.mxu0 %v1665_v2  ;;  %1794 = vmatpush1.bf16.msra.mxu1 %v1793_v3  ;;  %v2431_v21 = vmax.f32 %v287_v16, 0.0  ;;  %v2433_v22 = vpop.f32.mrb[6].mxu1  ;;  %v1681_v2 = vpack.c.bf16 %v604_v54, %v597_v53  ;;  %v1809_v3 = vpack.c.bf16 %v606_v58, %v599_v57  ;;  %v1813_v16 = vpack.c.bf16 %v620_v10, %v613_v9  ;;  %v649_v33 = vld [vmem:[#allocation8 + $0xad0] sm:$0xff]  ;;  %v668_v57 = vld [vmem:[#allocation8 + $0xb68] sm:$0xff]  ;;  %v675_v58 = vld [vmem:[#allocation8 + $0xba0] sm:$0xff] }
 0x146   :  { %1668 = vmatprep.subr.bf16.mxu0 %v1667_v7  ;;  %1796 = vmatprep.subr.bf16.mxu1 %v1795_v8  ;;  %v2435_v32 = vpop.f32.mrb[7].mxu1  ;;  %v1683_v7 = vpack.c.bf16 %v619_v60, %v612_v59  ;;  %v1811_v8 = vpack.c.bf16 %v621_v62, %v614_v61  ;;  %v1687_v19 = vpack.c.bf16 %v633_v12, %v626_v11  ;;  %v661_v43 = vld [vmem:[#allocation8 + $0xb30] sm:$0xff]  ;;  %v670_v59 = vld [vmem:[#allocation8 + $0xb78] sm:$0xff]  ;;  %v684_v11 = vld [vmem:[#allocation8 + $0xbe8] sm:$0xff] }
 0x147   :  { %929 = vmatprep.mubr.f32.mxu0 %v2431_v21  ;;  %1083 = vmatprep.mubr.f32.mxu1 %v2431_v21  ;;  %v1819_v39 = vpack.c.bf16 %v649_v33, %v642_v31  ;;  %v1695_v53 = vpack.c.bf16 %v661_v43, %v654_v42  ;;  %v1823_v54 = vpack.c.bf16 %v663_v47, %v656_v46  ;;  %v677_v60 = vld [vmem:[#allocation8 + $0xbb0] sm:$0xff]  ;;  %v682_v9 = vld [vmem:[#allocation8 + $0xbd8] sm:$0xff]  ;;  %v691_v12 = vld [vmem:[#allocation8 + $0xc20] sm:$0xff] }
 0x148   :  { %v1699_v4 = vpack.c.bf16 %v675_v58, %v668_v57  ;;  %v1827_v5 = vpack.c.bf16 %v677_v60, %v670_v59  ;;  %v689_v10 = vld [vmem:[#allocation8 + $0xc10] sm:$0xff]  ;;  %v712_v42 = vld [vmem:[#allocation8 + $0xcc8] sm:$0xff]  ;;  %v719_v43 = vld [vmem:[#allocation8 + $0xd00] sm:$0xff]  ;;  %v111_v59 = vsub.s32 2, %v2394_v26 }
 0x149   :  { %1670 = vmatpush1.bf16.msra.mxu0 %v1669_v17  ;;  %1798 = vmatpush1.bf16.msra.mxu1 %v1797_v18  ;;  %v625_v17 = vld [vmem:[#allocation8 + $0xa10] sm:$0xff]  ;;  %v632_v18 = vld [vmem:[#allocation8 + $0xa48] sm:$0xff]  ;;  %v726_v57 = vld [vmem:[#allocation8 + $0xd38] sm:$0xff] }
 0x14a   :  { %1672 = vmatprep.subr.bf16.mxu0 %v1671_v23  ;;  %1800 = vmatprep.subr.bf16.mxu1 %v1799_v24  ;;  %v627_v23 = vld [vmem:[#allocation8 + $0xa20] sm:$0xff]  ;;  %v634_v24 = vld [vmem:[#allocation8 + $0xa58] sm:$0xff]  ;;  %v1689_v34 = vpack.c.bf16 %v632_v18, %v625_v17  ;;  %v1703_v17 = vpack.c.bf16 %v689_v10, %v682_v9  ;;  %v1831_v18 = vpack.c.bf16 %v691_v12, %v684_v11  ;;  %v705_v30 = vld [vmem:[#allocation8 + $0xc90] sm:$0xff] }
 0x14b   :  { %v1817_v35 = vpack.c.bf16 %v634_v24, %v627_v23  ;;  %v696_v23 = vld [vmem:[#allocation8 + $0xc48] sm:$0xff]  ;;  %v703_v24 = vld [vmem:[#allocation8 + $0xc80] sm:$0xff]  ;;  %v733_v58 = vld [vmem:[#allocation8 + $0xd70] sm:$0xff]  ;;  %v112_v12 = vrot.slane %v2397_v28, %v111_v59 }
 0x14c   :  { %v745_v9 = vld [vmem:[#allocation8 + $0xdd0] sm:$0xff]  ;;  %v740_v10 = vld [vmem:[#allocation8 + $0xda8] sm:$0xff]  ;;  %v747_v11 = vld [vmem:[#allocation8 + $0xde0] sm:$0xff] }
 0x14d   :  { %1674 = vmatpush1.bf16.msra.mxu0 %v1673_v36  ;;  %1802 = vmatpush1.bf16.msra.mxu1 %v1801_v37  ;;  %v639_v36 = vld [vmem:[#allocation8 + $0xa80] sm:$0xff]  ;;  %v646_v37 = vld [vmem:[#allocation8 + $0xab8] sm:$0xff] }
 0x14e   :  { %1676 = vmatprep.subr.bf16.mxu0 %v1675_v40  ;;  %1804 = vmatprep.subr.bf16.mxu1 %v1803_v41  ;;  %v641_v40 = vld [vmem:[#allocation8 + $0xa90] sm:$0xff]  ;;  %v648_v41 = vld [vmem:[#allocation8 + $0xac8] sm:$0xff]  ;;  %v1693_v48 = vpack.c.bf16 %v646_v37, %v639_v36  ;;  %v1707_v36 = vpack.c.bf16 %v703_v24, %v696_v23  ;;  %v1835_v37 = vpack.c.bf16 %v705_v30, %v698_v25  ;;  %v315_v24 = vld [vmem:[#allocation8 + $0x60] sm:$0xff] }
 0x14f   :  { %v1821_v49 = vpack.c.bf16 %v648_v41, %v641_v40  ;;  %v710_v40 = vld [vmem:[#allocation8 + $0xcb8] sm:$0xff]  ;;  %v717_v41 = vld [vmem:[#allocation8 + $0xcf0] sm:$0xff]  ;;  %v308_v23 = vld [vmem:[#allocation8 + $0x28] sm:$0xff] }
 0x150   :  { %v421_v25 = vld [vmem:[#allocation8 + $0x3b0] sm:$0xff]  ;;  %v428_v30 = vld [vmem:[#allocation8 + $0x3e8] sm:$0xff] }
 0x151   :  { %1678 = vmatpush1.bf16.msra.mxu0 %v1677_v50  ;;  %1806 = vmatpush1.bf16.msra.mxu1 %v1805_v52  ;;  %v653_v50 = vld [vmem:[#allocation8 + $0xaf0] sm:$0xff]  ;;  %v660_v52 = vld [vmem:[#allocation8 + $0xb28] sm:$0xff] }
 0x152   :  { %1680 = vmatprep.subr.bf16.mxu0 %v1679_v55  ;;  %1808 = vmatprep.subr.bf16.mxu1 %v1807_v56  ;;  %v655_v55 = vld [vmem:[#allocation8 + $0xb00] sm:$0xff]  ;;  %v662_v56 = vld [vmem:[#allocation8 + $0xb38] sm:$0xff]  ;;  %v1697_v61 = vpack.c.bf16 %v660_v52, %v653_v50  ;;  %v1711_v50 = vpack.c.bf16 %v717_v41, %v710_v40  ;;  %v1839_v52 = vpack.c.bf16 %v719_v43, %v712_v42  ;;  %v316_v40 = vld [vmem:[#allocation8 + $0x68] sm:$0xff] }
 0x153   :  { %v1825_v62 = vpack.c.bf16 %v662_v56, %v655_v55  ;;  %v724_v55 = vld [vmem:[#allocation8 + $0xd28] sm:$0xff]  ;;  %v731_v56 = vld [vmem:[#allocation8 + $0xd60] sm:$0xff]  ;;  %v322_v41 = vld [vmem:[#allocation8 + $0x98] sm:$0xff] }
 0x154   :  { %v329_v43 = vld [vmem:[#allocation8 + $0xd0] sm:$0xff] }
 0x155   :  { %1682 = vmatpush1.bf16.msra.mxu0 %v1681_v2  ;;  %1810 = vmatpush1.bf16.msra.mxu1 %v1809_v3  ;;  %v667_v2 = vld [vmem:[#allocation8 + $0xb60] sm:$0xff]  ;;  %v674_v3 = vld [vmem:[#allocation8 + $0xb98] sm:$0xff] }
 0x156   :  { %1684 = vmatprep.subr.bf16.mxu0 %v1683_v7  ;;  %1812 = vmatprep.subr.bf16.mxu1 %v1811_v8  ;;  %v669_v7 = vld [vmem:[#allocation8 + $0xb70] sm:$0xff]  ;;  %v676_v8 = vld [vmem:[#allocation8 + $0xba8] sm:$0xff]  ;;  %v1701_v13 = vpack.c.bf16 %v674_v3, %v667_v2  ;;  %v730_v2 = vld [vmem:[#allocation8 + $0xd58] sm:$0xff]  ;;  %v1715_v3 = vpack.c.bf16 %v731_v56, %v724_v55 }
 0x157   :  { %v1829_v14 = vpack.c.bf16 %v676_v8, %v669_v7  ;;  %v732_v7 = vld [vmem:[#allocation8 + $0xd68] sm:$0xff]  ;;  %v738_v8 = vld [vmem:[#allocation8 + $0xd98] sm:$0xff] }
 0x158   :  { %v330_v55 = vld [vmem:[#allocation8 + $0xd8] sm:$0xff]  ;;  %v336_v56 = vld [vmem:[#allocation8 + $0x108] sm:$0xff] }
 0x159   :  { %1686 = vmatpush1.bf16.msra.mxu0 %v1685_v15  ;;  %1814 = vmatpush1.bf16.msra.mxu1 %v1813_v16  ;;  %v681_v15 = vld [vmem:[#allocation8 + $0xbd0] sm:$0xff]  ;;  %v688_v16 = vld [vmem:[#allocation8 + $0xc08] sm:$0xff] }
 0x15a   :  { %1688 = vmatprep.subr.bf16.mxu0 %v1687_v19  ;;  %1816 = vmatprep.subr.bf16.mxu1 %v1815_v20  ;;  %v683_v19 = vld [vmem:[#allocation8 + $0xbe0] sm:$0xff]  ;;  %v690_v20 = vld [vmem:[#allocation8 + $0xc18] sm:$0xff]  ;;  %v1705_v31 = vpack.c.bf16 %v688_v16, %v681_v15  ;;  %v737_v15 = vld [vmem:[#allocation8 + $0xd90] sm:$0xff] }
 0x15b   :  { %v1833_v33 = vpack.c.bf16 %v690_v20, %v683_v19  ;;  %v744_v16 = vld [vmem:[#allocation8 + $0xdc8] sm:$0xff]  ;;  %v739_v19 = vld [vmem:[#allocation8 + $0xda0] sm:$0xff]  ;;  %v746_v20 = vld [vmem:[#allocation8 + $0xdd8] sm:$0xff] }
 0x15c   :  { %v1721_v28 = vpack.c.bf16 %v744_v16, %v737_v15  ;;  %v349_v16 = vld [vmem:[#allocation8 + $0x170] sm:$0xff] }
 0x15d   :  { %1690 = vmatpush1.bf16.msra.mxu0 %v1689_v34  ;;  %1818 = vmatpush1.bf16.msra.mxu1 %v1817_v35  ;;  %v695_v34 = vld [vmem:[#allocation8 + $0xc40] sm:$0xff]  ;;  %v702_v35 = vld [vmem:[#allocation8 + $0xc78] sm:$0xff] }
 0x15e   :  { %1692 = vmatprep.subr.bf16.mxu0 %v1691_v38  ;;  %1820 = vmatprep.subr.bf16.mxu1 %v1819_v39  ;;  %v697_v38 = vld [vmem:[#allocation8 + $0xc50] sm:$0xff]  ;;  %v704_v39 = vld [vmem:[#allocation8 + $0xc88] sm:$0xff]  ;;  %v1709_v46 = vpack.c.bf16 %v702_v35, %v695_v34  ;;  %v307_v34 = vld [vmem:[#allocation8 + $0x20] sm:$0xff]  ;;  %v293_v35 = vadd.f32 %v2435_v32, %v2416_v63 }
 0x15f   :  { %v1837_v47 = vpack.c.bf16 %v704_v39, %v697_v38  ;;  %v314_v38 = vld [vmem:[#allocation8 + $0x58] sm:$0xff]  ;;  %v309_v39 = vld [vmem:[#allocation8 + $0x30] sm:$0xff]  ;;  %v328_v32 = vld [vmem:[#allocation8 + $0xc8] sm:$0xff] }
 0x160   :  { %v321_v63 = vld [vmem:[#allocation8 + $0x90] sm:$0xff] }
 0x161   :  { %1694 = vmatpush1.bf16.msra.mxu0 %v1693_v48  ;;  %1822 = vmatpush1.bf16.msra.mxu1 %v1821_v49  ;;  %v709_v48 = vld [vmem:[#allocation8 + $0xcb0] sm:$0xff]  ;;  %v716_v49 = vld [vmem:[#allocation8 + $0xce8] sm:$0xff] }
 0x162   :  { %1696 = vmatprep.subr.bf16.mxu0 %v1695_v53  ;;  %1824 = vmatprep.subr.bf16.mxu1 %v1823_v54  ;;  %v711_v53 = vld [vmem:[#allocation8 + $0xcc0] sm:$0xff]  ;;  %v718_v54 = vld [vmem:[#allocation8 + $0xcf8] sm:$0xff]  ;;  %v1713_v60 = vpack.c.bf16 %v716_v49, %v709_v48  ;;  %v1853_v48 = vpack.c.bf16 %v314_v38, %v307_v34  ;;  %v1981_v49 = vpack.c.bf16 %v316_v40, %v309_v39  ;;  %v385_v39 = vld [vmem:[#allocation8 + $0x290] sm:$0xff] }
 0x163   :  { %v370_v34 = vld [vmem:[#allocation8 + $0x218] sm:$0xff]  ;;  %v491_v40 = vld [vmem:[#allocation8 + $0x5e0] sm:$0xff] }
 0x164   :  { %v378_v38 = vld [vmem:[#allocation8 + $0x258] sm:$0xff] }
 0x165   :  { %1698 = vmatpush1.bf16.msra.mxu0 %v1697_v61  ;;  %1826 = vmatpush1.bf16.msra.mxu1 %v1825_v62  ;;  %v1841_v61 = vpack.c.bf16 %v718_v54, %v711_v53  ;;  %v723_v62 = vld [vmem:[#allocation8 + $0xd20] sm:$0xff] }
 0x166   :  { %1700 = vmatprep.subr.bf16.mxu0 %v1699_v4  ;;  %1828 = vmatprep.subr.bf16.mxu1 %v1827_v5  ;;  %v1843_v4 = vpack.c.bf16 %v733_v58, %v726_v57  ;;  %v725_v5 = vld [vmem:[#allocation8 + $0xd30] sm:$0xff]  ;;  %v323_v54 = vld [vmem:[#allocation8 + $0xa0] sm:$0xff] }
 0x167   :  { %v449_v58 = vld [vmem:[#allocation8 + $0x490] sm:$0xff] }
 0x169   :  { %1702 = vmatpush1.bf16.msra.mxu0 %v1701_v13  ;;  %1830 = vmatpush1.bf16.msra.mxu1 %v1829_v14  ;;  %v1717_v13 = vpack.c.bf16 %v730_v2, %v723_v62  ;;  %v1845_v14 = vpack.c.bf16 %v732_v7, %v725_v5  ;;  %v1985_v62 = vpack.c.bf16 %v330_v55, %v323_v54  ;;  %v335_v2 = vld [vmem:[#allocation8 + $0x100] sm:$0xff]  ;;  %v505_v54 = vld [vmem:[#allocation8 + $0x650] sm:$0xff]  ;;  %v512_v55 = vld [vmem:[#allocation8 + $0x688] sm:$0xff] }
 0x16a   :  { %1704 = vmatprep.subr.bf16.mxu0 %v1703_v17  ;;  %1832 = vmatprep.subr.bf16.mxu1 %v1831_v18  ;;  %v1719_v17 = vpack.c.bf16 %v745_v9, %v738_v8  ;;  %v1847_v18 = vpack.c.bf16 %v747_v11, %v740_v10  ;;  %v344_v8 = vld [vmem:[#allocation8 + $0x148] sm:$0xff]  ;;  %v350_v9 = vld [vmem:[#allocation8 + $0x178] sm:$0xff]  ;;  %v357_v10 = vld [vmem:[#allocation8 + $0x1b0] sm:$0xff] }
 0x16b   :  { %v463_v11 = vld [vmem:[#allocation8 + $0x500] sm:$0xff]  ;;  %v1863_v15 = vpack.c.bf16 %v357_v10, %v350_v9 }
 0x16d   :  { %1706 = vmatpush1.bf16.msra.mxu0 %v1705_v31  ;;  %1834 = vmatpush1.bf16.msra.mxu1 %v1833_v33  ;;  %v285_v31 = vadd.f32 %v2424_v6, %v112_v12  ;;  %v1849_v33 = vpack.c.bf16 %v746_v20, %v739_v19  ;;  %v291_v6 = vadd.f32 %v2433_v22, %v112_v12  ;;  %v343_v22 = vld [vmem:[#allocation8 + $0x140] sm:$0xff]  ;;  %v470_v12 = vld [vmem:[#allocation8 + $0x538] sm:$0xff] }
 0x16e   :  { %1708 = vmatprep.subr.bf16.mxu0 %v1707_v36  ;;  %1836 = vmatprep.subr.bf16.mxu1 %v1835_v37  ;;  %v1851_v36 = vpack.c.bf16 %v315_v24, %v308_v23  ;;  %v1979_v37 = vpack.c.bf16 %v428_v30, %v421_v25  ;;  %v1859_v5 = vpack.c.bf16 %v343_v22, %v336_v56  ;;  %v358_v20 = vld [vmem:[#allocation8 + $0x1b8] sm:$0xff]  ;;  %v364_v23 = vld [vmem:[#allocation8 + $0x1e8] sm:$0xff]  ;;  %v371_v24 = vld [vmem:[#allocation8 + $0x220] sm:$0xff] }
 0x16f   :  { %v2446_v42 = vmax.f32 %v285_v31, 0.0  ;;  %v2451_v57 = vmax.f32 %v291_v6, 0.0  ;;  %v1991_v19 = vpack.c.bf16 %v470_v12, %v463_v11  ;;  %v477_v25 = vld [vmem:[#allocation8 + $0x570] sm:$0xff]  ;;  %v484_v30 = vld [vmem:[#allocation8 + $0x5a8] sm:$0xff] }
 0x170   :  { %v405_v12 = vld [vmem:[#allocation8 + $0x330] sm:$0xff] }
 0x171   :  { %1710 = vmatpush1.bf16.msra.mxu0 %v1709_v46  ;;  %1838 = vmatpush1.bf16.msra.mxu1 %v1837_v47  ;;  %v435_v46 = vld [vmem:[#allocation8 + $0x420] sm:$0xff]  ;;  %v442_v47 = vld [vmem:[#allocation8 + $0x458] sm:$0xff] }
 0x172   :  { %1712 = vmatprep.subr.bf16.mxu0 %v1711_v50  ;;  %1840 = vmatprep.subr.bf16.mxu1 %v1839_v52  ;;  %v2449_v50 = vmax.f32 %v293_v35, 0.0  ;;  %v1855_v52 = vpack.c.bf16 %v329_v43, %v322_v41  ;;  %v1983_v53 = vpack.c.bf16 %v442_v47, %v435_v46  ;;  %v365_v35 = vld [vmem:[#allocation8 + $0x1f0] sm:$0xff]  ;;  %v498_v41 = vld [vmem:[#allocation8 + $0x618] sm:$0xff]  ;;  %v1871_v46 = vpack.c.bf16 %v385_v39, %v378_v38 }
 0x173   :  { %v377_v47 = vld [vmem:[#allocation8 + $0x250] sm:$0xff] }
 0x175   :  { %1714 = vmatpush1.bf16.msra.mxu0 %v1713_v60  ;;  %1842 = vmatpush1.bf16.msra.mxu1 %v1841_v61  ;;  %v456_v60 = vld [vmem:[#allocation8 + $0x4c8] sm:$0xff]  ;;  %v1857_v61 = vpack.c.bf16 %v328_v32, %v321_v63  ;;  %v1999_v63 = vpack.c.bf16 %v498_v41, %v491_v40  ;;  %v386_v32 = vld [vmem:[#allocation8 + $0x298] sm:$0xff]  ;;  %v433_v40 = vld [vmem:[#allocation8 + $0x410] sm:$0xff] }
 0x176   :  { %1716 = vmatprep.subr.bf16.mxu0 %v1715_v3  ;;  %1844 = vmatprep.subr.bf16.mxu1 %v1843_v4  ;;  %v342_v3 = vld [vmem:[#allocation8 + $0x138] sm:$0xff]  ;;  %v337_v4 = vld [vmem:[#allocation8 + $0x110] sm:$0xff]  ;;  %v1987_v7 = vpack.c.bf16 %v456_v60, %v449_v58  ;;  %v391_v60 = vld [vmem:[#allocation8 + $0x2c0] sm:$0xff] }
 0x177   :  { %v440_v41 = vld [vmem:[#allocation8 + $0x448] sm:$0xff] }
 0x179   :  { %1718 = vmatpush1.bf16.msra.mxu0 %v1717_v13  ;;  %1846 = vmatpush1.bf16.msra.mxu1 %v1845_v14  ;;  %v1861_v13 = vpack.c.bf16 %v342_v3, %v335_v2  ;;  %v1989_v14 = vpack.c.bf16 %v344_v8, %v337_v4  ;;  %v2003_v2 = vpack.c.bf16 %v512_v55, %v505_v54  ;;  %v400_v3 = vld [vmem:[#allocation8 + $0x308] sm:$0xff]  ;;  %v406_v4 = vld [vmem:[#allocation8 + $0x338] sm:$0xff]  ;;  %v447_v54 = vld [vmem:[#allocation8 + $0x480] sm:$0xff] }
 0x17a   :  { %1720 = vmatprep.subr.bf16.mxu0 %v1719_v17  ;;  %1848 = vmatprep.subr.bf16.mxu1 %v1847_v18  ;;  %v356_v17 = vld [vmem:[#allocation8 + $0x1a8] sm:$0xff]  ;;  %v351_v18 = vld [vmem:[#allocation8 + $0x180] sm:$0xff]  ;;  %v526_v8 = vld [vmem:[#allocation8 + $0x6f8] sm:$0xff] }
 0x17b   :  { %v1865_v31 = vpack.c.bf16 %v356_v17, %v349_v16  ;;  %v414_v16 = vld [vmem:[#allocation8 + $0x378] sm:$0xff]  ;;  %v420_v17 = vld [vmem:[#allocation8 + $0x3a8] sm:$0xff] }
 0x17c   :  { %v454_v55 = vld [vmem:[#allocation8 + $0x4b8] sm:$0xff] }
 0x17d   :  { %1722 = vmatpush1.bf16.msra.mxu0 %v1721_v28  ;;  %1850 = vmatpush1.bf16.msra.mxu1 %v1849_v33  ;;  %v1993_v28 = vpack.c.bf16 %v358_v20, %v351_v18  ;;  %v1867_v33 = vpack.c.bf16 %v371_v24, %v364_v23  ;;  %v427_v18 = vld [vmem:[#allocation8 + $0x3e0] sm:$0xff]  ;;  %v652_v20 = vld [vmem:[#allocation8 + $0xae8] sm:$0xff] }
 0x17e   :  { %1852 = vmatprep.subr.bf16.mxu0 %v1851_v36  ;;  %1980 = vmatprep.subr.bf16.mxu1 %v1979_v37  ;;  %v1995_v36 = vpack.c.bf16 %v484_v30, %v477_v25  ;;  %v372_v37 = vld [vmem:[#allocation8 + $0x228] sm:$0xff]  ;;  %v1883_v25 = vpack.c.bf16 %v427_v18, %v420_v17  ;;  %v419_v30 = vld [vmem:[#allocation8 + $0x3a0] sm:$0xff] }
 0x17f   :  { %v1997_v43 = vpack.c.bf16 %v372_v37, %v365_v35  ;;  %v441_v35 = vld [vmem:[#allocation8 + $0x450] sm:$0xff]  ;;  %v666_v37 = vld [vmem:[#allocation8 + $0xb58] sm:$0xff] }
 0x180   :  { %930 = vmatmul.mubr.f32.vlgmr.msra.gmra.mrb[0].mxu0 %v2446_v42  ;;  %1084 = vmatmul.mubr.f32.vlgmr.msra.gmra.mrb[8].mxu1 %v2446_v42 }
 0x181   :  { %1854 = vmatpush1.bf16.msra.mxu0 %v1853_v48  ;;  %1982 = vmatpush3.bf16.msra.mxu1 %v1981_v49  ;;  %v384_v48 = vld [vmem:[#allocation8 + $0x288] sm:$0xff]  ;;  %v379_v49 = vld [vmem:[#allocation8 + $0x260] sm:$0xff] }
 0x182   :  { %935 = vmatprep.mubr.f32.mxu0 %v2449_v50  ;;  %1089 = vmatprep.mubr.f32.mxu1 %v2449_v50  ;;  %v1873_v56 = vpack.c.bf16 %v384_v48, %v377_v47  ;;  %v2001_v22 = vpack.c.bf16 %v386_v32, %v379_v49  ;;  %v554_v47 = vld [vmem:[#allocation8 + $0x7d8] sm:$0xff]  ;;  %v448_v48 = vld [vmem:[#allocation8 + $0x488] sm:$0xff]  ;;  %v455_v49 = vld [vmem:[#allocation8 + $0x4c0] sm:$0xff] }
 0x183   :  { %1856 = vmatprep.subr.bf16.mxu0 %v1855_v52  ;;  %1984 = vmatprep.subr.bf16.mxu1 %v1983_v53  ;;  %v392_v52 = vld [vmem:[#allocation8 + $0x2c8] sm:$0xff]  ;;  %v399_v53 = vld [vmem:[#allocation8 + $0x300] sm:$0xff] }
 0x184   :  { %936 = vmatmul.mubr.f32.gmra.mrb[2].mxu0 %v2451_v57  ;;  %1090 = vmatmul.mubr.f32.gmra.mrb[10].mxu1 %v2451_v57  ;;  %v1875_v58 = vpack.c.bf16 %v399_v53, %v392_v52  ;;  %v680_v32 = vld [vmem:[#allocation8 + $0xbc8] sm:$0xff]  ;;  %v1889_v52 = vpack.c.bf16 %v440_v41, %v433_v40  ;;  %v610_v41 = vld [vmem:[#allocation8 + $0x998] sm:$0xff] }
 0x185   :  { %1858 = vmatpush1.bf16.msra.mxu0 %v1857_v61  ;;  %1160 = vmatprep.mubr.f32.mxu0 %v2407_v45  ;;  %v398_v61 = vld [vmem:[#allocation8 + $0x2f8] sm:$0xff] }
 0x186   :  { %1986 = vmatpush3.bf16.msra.mxu1 %v1985_v62  ;;  %1314 = vmatprep.mubr.f32.mxu1 %v2407_v45  ;;  %v363_v45 = vld [vmem:[#allocation8 + $0x1e0] sm:$0xff]  ;;  %v393_v62 = vld [vmem:[#allocation8 + $0x2d0] sm:$0xff]  ;;  %v1877_v9 = vpack.c.bf16 %v398_v61, %v391_v60  ;;  %v568_v60 = vld [vmem:[#allocation8 + $0x848] sm:$0xff] }
 0x187   :  { %1860 = vmatprep.subr.bf16.mxu0 %v1859_v5  ;;  %1988 = vmatprep.subr.bf16.mxu1 %v1987_v7  ;;  %v1869_v6 = vpack.c.bf16 %v370_v34, %v363_v45  ;;  %v413_v5 = vld [vmem:[#allocation8 + $0x370] sm:$0xff]  ;;  %v519_v7 = vld [vmem:[#allocation8 + $0x6c0] sm:$0xff]  ;;  %v2005_v10 = vpack.c.bf16 %v400_v3, %v393_v62  ;;  %v540_v45 = vld [vmem:[#allocation8 + $0x768] sm:$0xff] }
 0x188   :  { %v1879_v11 = vpack.c.bf16 %v413_v5, %v406_v4  ;;  %v434_v34 = vld [vmem:[#allocation8 + $0x418] sm:$0xff]  ;;  %v469_v62 = vld [vmem:[#allocation8 + $0x530] sm:$0xff]  ;;  %v1893_v4 = vpack.c.bf16 %v454_v55, %v447_v54  ;;  %v624_v55 = vld [vmem:[#allocation8 + $0xa08] sm:$0xff] }
 0x189   :  { %1862 = vmatpush1.bf16.msra.mxu0 %v1861_v13  ;;  %v412_v13 = vld [vmem:[#allocation8 + $0x368] sm:$0xff]  ;;  %v462_v61 = vld [vmem:[#allocation8 + $0x4f8] sm:$0xff] }
 0x18a   :  { %1990 = vmatpush3.bf16.msra.mxu1 %v1989_v14  ;;  %1864 = vmatprep.subr.bf16.mxu0 %v1863_v15  ;;  %v407_v14 = vld [vmem:[#allocation8 + $0x340] sm:$0xff]  ;;  %v2007_v15 = vpack.c.bf16 %v526_v8, %v519_v7  ;;  %v1881_v23 = vpack.c.bf16 %v412_v13, %v405_v12  ;;  %v694_v3 = vld [vmem:[#allocation8 + $0xc38] sm:$0xff]  ;;  %v1895_v7 = vpack.c.bf16 %v469_v62, %v462_v61  ;;  %v461_v8 = vld [vmem:[#allocation8 + $0x4f0] sm:$0xff] }
 0x18b   :  { %1992 = vmatprep.subr.bf16.mxu1 %v1991_v19  ;;  %v645_v19 = vld [vmem:[#allocation8 + $0xab0] sm:$0xff]  ;;  %v2009_v24 = vpack.c.bf16 %v414_v16, %v407_v14  ;;  %v582_v12 = vld [vmem:[#allocation8 + $0x8b8] sm:$0xff]  ;;  %v476_v13 = vld [vmem:[#allocation8 + $0x568] sm:$0xff] }
 0x18c   :  { %v483_v14 = vld [vmem:[#allocation8 + $0x5a0] sm:$0xff]  ;;  %v708_v16 = vld [vmem:[#allocation8 + $0xca8] sm:$0xff] }
 0x18d   :  { %1866 = vmatpush1.bf16.msra.mxu0 %v1865_v31  ;;  %v426_v31 = vld [vmem:[#allocation8 + $0x3d8] sm:$0xff] }
 0x18e   :  { %1994 = vmatpush3.bf16.msra.mxu1 %v1993_v28  ;;  %1868 = vmatprep.subr.bf16.mxu0 %v1867_v33  ;;  %v2011_v28 = vpack.c.bf16 %v652_v20, %v645_v19  ;;  %v533_v33 = vld [vmem:[#allocation8 + $0x730] sm:$0xff]  ;;  %v1885_v38 = vpack.c.bf16 %v426_v31, %v419_v30  ;;  %v1899_v19 = vpack.c.bf16 %v483_v14, %v476_v13  ;;  %v475_v20 = vld [vmem:[#allocation8 + $0x560] sm:$0xff]  ;;  %v596_v30 = vld [vmem:[#allocation8 + $0x928] sm:$0xff] }
 0x18f   :  { %1996 = vmatprep.subr.bf16.mxu1 %v1995_v36  ;;  %v659_v36 = vld [vmem:[#allocation8 + $0xb20] sm:$0xff]  ;;  %v2013_v39 = vpack.c.bf16 %v540_v45, %v533_v33  ;;  %v490_v31 = vld [vmem:[#allocation8 + $0x5d8] sm:$0xff] }
 0x190   :  { %v715_v33 = vld [vmem:[#allocation8 + $0xce0] sm:$0xff]  ;;  %v722_v45 = vld [vmem:[#allocation8 + $0xd18] sm:$0xff] }
 0x191   :  { %1870 = vmatpush1.bf16.msra.mxu0 %v1869_v6  ;;  %v1887_v6 = vpack.c.bf16 %v441_v35, %v434_v34  ;;  %v2031_v40 = vpack.c.bf16 %v722_v45, %v715_v33  ;;  %v531_v14 = vld [vmem:[#allocation8 + $0x720] sm:$0xff]  ;;  %v566_v33 = vld [vmem:[#allocation8 + $0x838] sm:$0xff] }
 0x192   :  { %1998 = vmatpush3.bf16.msra.mxu1 %v1997_v43  ;;  %1872 = vmatprep.subr.bf16.mxu0 %v1871_v46  ;;  %v2015_v43 = vpack.c.bf16 %v666_v37, %v659_v36  ;;  %v547_v46 = vld [vmem:[#allocation8 + $0x7a0] sm:$0xff]  ;;  %v489_v37 = vld [vmem:[#allocation8 + $0x5d0] sm:$0xff]  ;;  %v574_v45 = vld [vmem:[#allocation8 + $0x878] sm:$0xff] }
 0x193   :  { %2000 = vmatprep.subr.bf16.mxu1 %v1999_v63  ;;  %v673_v63 = vld [vmem:[#allocation8 + $0xb90] sm:$0xff]  ;;  %v2017_v53 = vpack.c.bf16 %v554_v47, %v547_v46  ;;  %v736_v47 = vld [vmem:[#allocation8 + $0xd88] sm:$0xff] }
 0x194   :  { %v729_v46 = vld [vmem:[#allocation8 + $0xd50] sm:$0xff] }
 0x195   :  { %1874 = vmatpush1.bf16.msra.mxu0 %v1873_v56  ;;  %v561_v56 = vld [vmem:[#allocation8 + $0x810] sm:$0xff]  ;;  %v2035_v54 = vpack.c.bf16 %v736_v47, %v729_v46 }
 0x196   :  { %2002 = vmatpush3.bf16.msra.mxu1 %v2001_v22  ;;  %1876 = vmatprep.subr.bf16.mxu0 %v1875_v58  ;;  %v1891_v22 = vpack.c.bf16 %v455_v49, %v448_v48  ;;  %v2019_v58 = vpack.c.bf16 %v680_v32, %v673_v63  ;;  %v2021_v5 = vpack.c.bf16 %v568_v60, %v561_v56  ;;  %v503_v32 = vld [vmem:[#allocation8 + $0x640] sm:$0xff]  ;;  %v518_v56 = vld [vmem:[#allocation8 + $0x6b8] sm:$0xff]  ;;  %v601_v47 = vld [vmem:[#allocation8 + $0x950] sm:$0xff] }
 0x197   :  { %2004 = vmatprep.subr.bf16.mxu1 %v2003_v2  ;;  %v687_v2 = vld [vmem:[#allocation8 + $0xc00] sm:$0xff]  ;;  %v750_v60 = vld [vmem:[#allocation8 + $0xdf8] sm:$0xff] }
 0x199   :  { %1878 = vmatpush1.bf16.msra.mxu0 %v1877_v9  ;;  %v468_v9 = vld [vmem:[#allocation8 + $0x528] sm:$0xff] }
 0x19a   :  { %2006 = vmatpush3.bf16.msra.mxu1 %v2005_v10  ;;  %1880 = vmatprep.subr.bf16.mxu0 %v1879_v11  ;;  %v575_v10 = vld [vmem:[#allocation8 + $0x880] sm:$0xff]  ;;  %v2023_v11 = vpack.c.bf16 %v694_v3, %v687_v2  ;;  %v1897_v17 = vpack.c.bf16 %v468_v9, %v461_v8  ;;  %v517_v3 = vld [vmem:[#allocation8 + $0x6b0] sm:$0xff]  ;;  %v638_v8 = vld [vmem:[#allocation8 + $0xa78] sm:$0xff] }
 0x19b   :  { %2008 = vmatprep.subr.bf16.mxu1 %v2007_v15  ;;  %v701_v15 = vld [vmem:[#allocation8 + $0xc70] sm:$0xff]  ;;  %v2025_v18 = vpack.c.bf16 %v582_v12, %v575_v10  ;;  %v532_v9 = vld [vmem:[#allocation8 + $0x728] sm:$0xff]  ;;  %v539_v10 = vld [vmem:[#allocation8 + $0x760] sm:$0xff] }
 0x19c   :  { %v1915_v13 = vpack.c.bf16 %v539_v10, %v532_v9  ;;  %v665_v9 = vld [vmem:[#allocation8 + $0xb50] sm:$0xff] }
 0x19d   :  { %1882 = vmatpush1.bf16.msra.mxu0 %v1881_v23  ;;  %v482_v23 = vld [vmem:[#allocation8 + $0x598] sm:$0xff] }
 0x19e   :  { %2010 = vmatpush3.bf16.msra.mxu1 %v2009_v24  ;;  %1884 = vmatprep.subr.bf16.mxu0 %v1883_v25  ;;  %v589_v24 = vld [vmem:[#allocation8 + $0x8f0] sm:$0xff]  ;;  %v2027_v25 = vpack.c.bf16 %v708_v16, %v701_v15  ;;  %v1901_v34 = vpack.c.bf16 %v482_v23, %v475_v20  ;;  %v538_v15 = vld [vmem:[#allocation8 + $0x758] sm:$0xff]  ;;  %v552_v23 = vld [vmem:[#allocation8 + $0x7c8] sm:$0xff] }
 0x19f   :  { %2012 = vmatprep.subr.bf16.mxu1 %v2011_v28  ;;  %v497_v28 = vld [vmem:[#allocation8 + $0x610] sm:$0xff]  ;;  %v2029_v35 = vpack.c.bf16 %v596_v30, %v589_v24  ;;  %v546_v16 = vld [vmem:[#allocation8 + $0x798] sm:$0xff]  ;;  %v560_v24 = vld [vmem:[#allocation8 + $0x808] sm:$0xff] }
 0x1a0   :  { %v1903_v36 = vpack.c.bf16 %v497_v28, %v490_v31  ;;  %v545_v20 = vld [vmem:[#allocation8 + $0x790] sm:$0xff]  ;;  %v559_v28 = vld [vmem:[#allocation8 + $0x800] sm:$0xff] }
 0x1a1   :  { %1315 = vmatmul.mubr.f32.vlgmr.msra.gmra.mrb[12].mxu1 %v2409_v51  ;;  %1886 = vmatpush1.bf16.msra.mxu0 %v1885_v38  ;;  %v496_v38 = vld [vmem:[#allocation8 + $0x608] sm:$0xff]  ;;  %v1921_v30 = vpack.c.bf16 %v552_v23, %v545_v20  ;;  %v686_v20 = vld [vmem:[#allocation8 + $0xbf8] sm:$0xff]  ;;  %v693_v23 = vld [vmem:[#allocation8 + $0xc30] sm:$0xff] }
 0x1a2   :  { %1319 = vmatprep.mubr.f32.mxu1 %v2422_v0  ;;  %2014 = vmatpush3.bf16.msra.mxu1 %v2013_v39  ;;  %v603_v39 = vld [vmem:[#allocation8 + $0x960] sm:$0xff]  ;;  %v1905_v48 = vpack.c.bf16 %v496_v38, %v489_v37  ;;  %v588_v37 = vld [vmem:[#allocation8 + $0x8e8] sm:$0xff] }
 0x1a3   :  { %1888 = vmatprep.subr.bf16.mxu0 %v1887_v6  ;;  %2016 = vmatprep.subr.bf16.mxu1 %v2015_v43  ;;  %v504_v6 = vld [vmem:[#allocation8 + $0x648] sm:$0xff]  ;;  %v511_v43 = vld [vmem:[#allocation8 + $0x680] sm:$0xff]  ;;  %v2033_v49 = vpack.c.bf16 %v610_v41, %v603_v39 }
 0x1a4   :  { %v1907_v63 = vpack.c.bf16 %v511_v43, %v504_v6  ;;  %v595_v38 = vld [vmem:[#allocation8 + $0x920] sm:$0xff]  ;;  %v602_v6 = vld [vmem:[#allocation8 + $0x958] sm:$0xff]  ;;  %v609_v43 = vld [vmem:[#allocation8 + $0x990] sm:$0xff] }
 0x1a5   :  { %1320 = vmatmul.mubr.f32.gmra.mrb[14].mxu1 %v2420_v1  ;;  %1890 = vmatpush1.bf16.msra.mxu0 %v1889_v52  ;;  %v510_v52 = vld [vmem:[#allocation8 + $0x678] sm:$0xff]  ;;  %v587_v41 = vld [vmem:[#allocation8 + $0x8e0] sm:$0xff] }
 0x1a6   :  { %2018 = vmatpush3.bf16.msra.mxu1 %v2017_v53  ;;  %1389 = vmatprep.mubr.f32.mxu1 %v2431_v21  ;;  %v617_v53 = vld [vmem:[#allocation8 + $0x9d0] sm:$0xff]  ;;  %v1909_v61 = vpack.c.bf16 %v510_v52, %v503_v32 }
 0x1a7   :  { %1892 = vmatprep.subr.bf16.mxu0 %v1891_v22  ;;  %2020 = vmatprep.subr.bf16.mxu1 %v2019_v58  ;;  %v525_v22 = vld [vmem:[#allocation8 + $0x6f0] sm:$0xff]  ;;  %v743_v58 = vld [vmem:[#allocation8 + $0xdc0] sm:$0xff]  ;;  %v2037_v62 = vpack.c.bf16 %v624_v55, %v617_v53  ;;  %v630_v55 = vld [vmem:[#allocation8 + $0xa38] sm:$0xff] }
 0x1a8   :  { %v1911_v2 = vpack.c.bf16 %v525_v22, %v518_v56  ;;  %v615_v53 = vld [vmem:[#allocation8 + $0x9c0] sm:$0xff]  ;;  %v637_v56 = vld [vmem:[#allocation8 + $0xa70] sm:$0xff] }
 0x1a9   :  { %1894 = vmatpush1.bf16.msra.mxu0 %v1893_v4  ;;  %v524_v4 = vld [vmem:[#allocation8 + $0x6e8] sm:$0xff] }
 0x1aa   :  { %2022 = vmatpush3.bf16.msra.mxu1 %v2021_v5  ;;  %1896 = vmatprep.subr.bf16.mxu0 %v1895_v7  ;;  %v631_v5 = vld [vmem:[#allocation8 + $0xa40] sm:$0xff]  ;;  %v2039_v7 = vpack.c.bf16 %v750_v60, %v743_v58  ;;  %v1943_v58 = vpack.c.bf16 %v637_v56, %v630_v55  ;;  %v629_v60 = vld [vmem:[#allocation8 + $0xa30] sm:$0xff] }
 0x1ab   :  { %2024 = vmatprep.subr.bf16.mxu1 %v2023_v11  ;;  %v1913_v11 = vpack.c.bf16 %v524_v4, %v517_v3  ;;  %v2041_v12 = vpack.c.bf16 %v638_v8, %v631_v5  ;;  %v643_v5 = vld [vmem:[#allocation8 + $0xaa0] sm:$0xff]  ;;  %v658_v8 = vld [vmem:[#allocation8 + $0xb18] sm:$0xff] }
 0x1ad   :  { %1898 = vmatpush1.bf16.msra.mxu0 %v1897_v17  ;;  %v553_v17 = vld [vmem:[#allocation8 + $0x7d0] sm:$0xff] }
 0x1ae   :  { %2026 = vmatpush3.bf16.msra.mxu1 %v2025_v18  ;;  %1900 = vmatprep.subr.bf16.mxu0 %v1899_v19  ;;  %v1917_v18 = vpack.c.bf16 %v538_v15, %v531_v14  ;;  %v1919_v19 = vpack.c.bf16 %v553_v17, %v546_v16  ;;  %v672_v14 = vld [vmem:[#allocation8 + $0xb88] sm:$0xff]  ;;  %v679_v15 = vld [vmem:[#allocation8 + $0xbc0] sm:$0xff] }
 0x1af   :  { %2028 = vmatprep.subr.bf16.mxu1 %v2027_v25  ;;  %v567_v25 = vld [vmem:[#allocation8 + $0x840] sm:$0xff]  ;;  %v1955_v17 = vpack.c.bf16 %v679_v15, %v672_v14 }
 0x1b0   :  { %v1923_v31 = vpack.c.bf16 %v567_v25, %v560_v24  ;;  %v1959_v25 = vpack.c.bf16 %v693_v23, %v686_v20 }
 0x1b1   :  { %1902 = vmatpush1.bf16.msra.mxu0 %v1901_v34  ;;  %v581_v34 = vld [vmem:[#allocation8 + $0x8b0] sm:$0xff] }
 0x1b2   :  { %2030 = vmatpush3.bf16.msra.mxu1 %v2029_v35  ;;  %1904 = vmatprep.subr.bf16.mxu0 %v1903_v36  ;;  %v573_v35 = vld [vmem:[#allocation8 + $0x870] sm:$0xff]  ;;  %v580_v36 = vld [vmem:[#allocation8 + $0x8a8] sm:$0xff] }
 0x1b3   :  { %2032 = vmatprep.subr.bf16.mxu1 %v2031_v40  ;;  %v1929_v39 = vpack.c.bf16 %v580_v36, %v573_v35  ;;  %v1931_v40 = vpack.c.bf16 %v595_v38, %v588_v37  ;;  %v714_v35 = vld [vmem:[#allocation8 + $0xcd8] sm:$0xff]  ;;  %v721_v36 = vld [vmem:[#allocation8 + $0xd10] sm:$0xff] }
 0x1b4   :  { %v1967_v38 = vpack.c.bf16 %v721_v36, %v714_v35 }
 0x1b5   :  { %1906 = vmatpush1.bf16.msra.mxu0 %v1905_v48  ;;  %v608_v48 = vld [vmem:[#allocation8 + $0x988] sm:$0xff] }
 0x1b6   :  { %2034 = vmatpush3.bf16.msra.mxu1 %v2033_v49  ;;  %1908 = vmatprep.subr.bf16.mxu0 %v1907_v63  ;;  %v616_v49 = vld [vmem:[#allocation8 + $0x9c8] sm:$0xff]  ;;  %v623_v63 = vld [vmem:[#allocation8 + $0xa00] sm:$0xff]  ;;  %v1937_v32 = vpack.c.bf16 %v608_v48, %v601_v47  ;;  %v742_v47 = vld [vmem:[#allocation8 + $0xdb8] sm:$0xff] }
 0x1b7   :  { %2036 = vmatprep.subr.bf16.mxu1 %v2035_v54  ;;  %v1939_v52 = vpack.c.bf16 %v623_v63, %v616_v49  ;;  %v622_v54 = vld [vmem:[#allocation8 + $0x9f8] sm:$0xff]  ;;  %v749_v48 = vld [vmem:[#allocation8 + $0xdf0] sm:$0xff] }
 0x1b8   :  { %v1941_v22 = vpack.c.bf16 %v622_v54, %v615_v53  ;;  %v1975_v63 = vpack.c.bf16 %v749_v48, %v742_v47  ;;  %v2475_v54 = vld [vmem:[#allocation10] sm:$0xff] }
 0x1b9   :  { %1910 = vmatpush1.bf16.msra.mxu0 %v1909_v61  ;;  %v636_v61 = vld [vmem:[#allocation8 + $0xa68] sm:$0xff]  ;;  %v756_v55 = vrot.slane %v2475_v54, %v103_v27  ;;  %v764_v56 = vrot.slane %v2475_v54, %v111_v59 }
 0x1ba   :  { %2038 = vmatpush3.bf16.msra.mxu1 %v2037_v62  ;;  %1912 = vmatprep.subr.bf16.mxu0 %v1911_v2  ;;  %v644_v62 = vld [vmem:[#allocation8 + $0xaa8] sm:$0xff]  ;;  %v651_v2 = vld [vmem:[#allocation8 + $0xae0] sm:$0xff]  ;;  %v1945_v3 = vpack.c.bf16 %v636_v61, %v629_v60 }
 0x1bb   :  { %2040 = vmatprep.subr.bf16.mxu1 %v2039_v7  ;;  %v1947_v4 = vpack.c.bf16 %v651_v2, %v644_v62  ;;  %v650_v7 = vld [vmem:[#allocation8 + $0xad8] sm:$0xff] }
 0x1bc   :  { %v1949_v10 = vpack.c.bf16 %v650_v7, %v643_v5 }
 0x1bd   :  { %1914 = vmatpush1.bf16.msra.mxu0 %v1913_v11  ;;  %v1951_v11 = vpack.c.bf16 %v665_v9, %v658_v8 }
 0x1be   :  { %2042 = vmatpush3.bf16.msra.mxu1 %v2041_v12  ;;  %1916 = vmatprep.subr.bf16.mxu0 %v1915_v13  ;;  %v657_v12 = vld [vmem:[#allocation8 + $0xb10] sm:$0xff]  ;;  %v664_v13 = vld [vmem:[#allocation8 + $0xb48] sm:$0xff] }
 0x1bf   :  { %v1953_v16 = vpack.c.bf16 %v664_v13, %v657_v12 }
 0x1c0   :  { %1161 = vmatmul.mubr.f32.vlgmr.msra.gmra.mrb[4].mxu0 %v2409_v51  ;;  %v1925_v51 = vpack.c.bf16 %v566_v33, %v559_v28  ;;  %v700_v28 = vld [vmem:[#allocation8 + $0xc68] sm:$0xff]  ;;  %v707_v33 = vld [vmem:[#allocation8 + $0xca0] sm:$0xff] }
 0x1c1   :  { %1390 = vmatmul.mubr.f32.vlgmr.msra.gmra.mrb[16].mxu1 %v2446_v42  ;;  %1166 = vmatprep.mubr.f32.mxu0 %v2422_v0  ;;  %v1927_v0 = vpack.c.bf16 %v581_v34, %v574_v45  ;;  %v1963_v34 = vpack.c.bf16 %v707_v33, %v700_v28 }
 0x1c2   :  { %1918 = vmatpush1.bf16.msra.mxu0 %v1917_v18  ;;  %1394 = vmatprep.mubr.f32.mxu1 %v2449_v50  ;;  %v671_v18 = vld [vmem:[#allocation8 + $0xb80] sm:$0xff] }
 0x1c3   :  { %1920 = vmatprep.subr.bf16.mxu0 %v1919_v19  ;;  %v678_v19 = vld [vmem:[#allocation8 + $0xbb8] sm:$0xff] }
 0x1c4   :  { %1167 = vmatmul.mubr.f32.gmra.mrb[6].mxu0 %v2420_v1  ;;  %v594_v1 = vld [vmem:[#allocation8 + $0x918] sm:$0xff]  ;;  %v1957_v24 = vpack.c.bf16 %v678_v19, %v671_v18 }
 0x1c5   :  { %1395 = vmatmul.mubr.f32.gmra.mrb[18].mxu1 %v2451_v57  ;;  %1237 = vmatprep.mubr.f32.mxu0 %v2431_v21  ;;  %v1933_v46 = vpack.c.bf16 %v594_v1, %v587_v41  ;;  %v1935_v21 = vpack.c.bf16 %v609_v43, %v602_v6  ;;  %v728_v41 = vld [vmem:[#allocation8 + $0xd48] sm:$0xff]  ;;  %v735_v1 = vld [vmem:[#allocation8 + $0xd80] sm:$0xff] }
 0x1c6   :  { %1922 = vmatpush1.bf16.msra.mxu0 %v1921_v30  ;;  %v685_v30 = vld [vmem:[#allocation8 + $0xbf0] sm:$0xff]  ;;  %v1971_v43 = vpack.c.bf16 %v735_v1, %v728_v41 }
 0x1c7   :  { %1924 = vmatprep.subr.bf16.mxu0 %v1923_v31  ;;  %v692_v31 = vld [vmem:[#allocation8 + $0xc28] sm:$0xff] }
 0x1c8   :  { %v1961_v45 = vpack.c.bf16 %v692_v31, %v685_v30 }
 0x1ca   :  { %1926 = vmatpush1.bf16.msra.mxu0 %v1925_v51  ;;  %v699_v51 = vld [vmem:[#allocation8 + $0xc60] sm:$0xff] }
 0x1cb   :  { %1928 = vmatprep.subr.bf16.mxu0 %v1927_v0  ;;  %v706_v0 = vld [vmem:[#allocation8 + $0xc98] sm:$0xff] }
 0x1cc   :  { %v1965_v37 = vpack.c.bf16 %v706_v0, %v699_v51 }
 0x1ce   :  { %1930 = vmatpush1.bf16.msra.mxu0 %v1929_v39  ;;  %v713_v39 = vld [vmem:[#allocation8 + $0xcd0] sm:$0xff] }
 0x1cf   :  { %1932 = vmatprep.subr.bf16.mxu0 %v1931_v40  ;;  %v720_v40 = vld [vmem:[#allocation8 + $0xd08] sm:$0xff] }
 0x1d0   :  { %v1969_v6 = vpack.c.bf16 %v720_v40, %v713_v39 }
 0x1d2   :  { %1934 = vmatpush1.bf16.msra.mxu0 %v1933_v46  ;;  %v727_v46 = vld [vmem:[#allocation8 + $0xd40] sm:$0xff] }
 0x1d3   :  { %1936 = vmatprep.subr.bf16.mxu0 %v1935_v21  ;;  %v734_v21 = vld [vmem:[#allocation8 + $0xd78] sm:$0xff] }
 0x1d4   :  { %v1973_v49 = vpack.c.bf16 %v734_v21, %v727_v46 }
 0x1d6   :  { %1938 = vmatpush1.bf16.msra.mxu0 %v1937_v32  ;;  %v741_v32 = vld [vmem:[#allocation8 + $0xdb0] sm:$0xff] }
 0x1d7   :  { %1940 = vmatprep.subr.bf16.mxu0 %v1939_v52  ;;  %v748_v52 = vld [vmem:[#allocation8 + $0xde8] sm:$0xff] }
 0x1d8   :  { %v1977_v53 = vpack.c.bf16 %v748_v52, %v741_v32 }
 0x1da   :  { %1942 = vmatpush1.bf16.msra.mxu0 %v1941_v22  ;;  %v760_v22 = vrot.slane %v2475_v54, %v107_v29 }
 0x1db   :  { %1944 = vmatprep.subr.bf16.mxu0 %v1943_v58 }
 0x1de   :  { %1946 = vmatpush1.bf16.msra.mxu0 %v1945_v3 }
 0x1df   :  { %1948 = vmatprep.subr.bf16.mxu0 %v1947_v4 }
 0x1e2   :  { %1950 = vmatpush1.bf16.msra.mxu0 %v1949_v10 }
 0x1e3   :  { %1952 = vmatprep.subr.bf16.mxu0 %v1951_v11 }
 0x1e6   :  { %1954 = vmatpush1.bf16.msra.mxu0 %v1953_v16 }
 0x1e7   :  { %1956 = vmatprep.subr.bf16.mxu0 %v1955_v17 }
 0x1ea   :  { %1958 = vmatpush1.bf16.msra.mxu0 %v1957_v24 }
 0x1eb   :  { %1960 = vmatprep.subr.bf16.mxu0 %v1959_v25 }
 0x1ee   :  { %1962 = vmatpush1.bf16.msra.mxu0 %v1961_v45 }
 0x1ef   :  { %1964 = vmatprep.subr.bf16.mxu0 %v1963_v34 }
 0x1f2   :  { %1966 = vmatpush1.bf16.msra.mxu0 %v1965_v37 }
 0x1f3   :  { %1968 = vmatprep.subr.bf16.mxu0 %v1967_v38 }
 0x1f6   :  { %1970 = vmatpush1.bf16.msra.mxu0 %v1969_v6 }
 0x1f7   :  { %1972 = vmatprep.subr.bf16.mxu0 %v1971_v43 }
 0x1fa   :  { %1974 = vmatpush1.bf16.msra.mxu0 %v1973_v49 }
 0x1fb   :  { %1976 = vmatprep.subr.bf16.mxu0 %v1975_v63 }
 0x1fe   :  { %1978 = vmatpush1.bf16.msra.mxu0 %v1977_v53 }
 0x201   :  { %1238 = vmatmul.mubr.f32.vlgmr.msra.gmra.mrb[4].mxu0 %v2446_v42  ;;  %v768_v42 = vrot.slane %v2475_v54, %v115_v44 }
 0x202   :  { %1243 = vmatprep.mubr.f32.mxu0 %v2449_v50 }
 0x205   :  { %1244 = vmatmul.mubr.f32.gmra.mrb[6].mxu0 %v2451_v57 }
 0x253   :  { %v931_v50 = vpop.f32.mrb[0].mxu0  ;;  %v1085_v57 = vpop.f32.mrb[8].mxu1 }
 0x254   :  { %v2043_v58 = vadd.f32 %v931_v50, %v756_v55  ;;  %v2047_v60 = vadd.f32 %v1085_v57, %v764_v56  ;;  %v933_v61 = vpop.f32.mrb[1].mxu0  ;;  %v1087_v62 = vpop.f32.mrb[9].mxu1  ;;  %v779_v50 = vsub.s32 6, %v2394_v26 }
 0x255   :  { %v2044_v2 = vadd.f32 %v933_v61, %v760_v22  ;;  %v2048_v27 = vadd.f32 %v1087_v62, %v768_v42 }
 0x256   :  { %v1400_v3 = vsub.f32 0.0, %v2043_v58  ;;  %v1402_v4 = vsub.f32 0.0, %v2047_v60  ;;  %v780_v57 = vrot.slane %v2475_v54, %v779_v50 }
 0x257   :  { %v1401_v5 = vsub.f32 0.0, %v2044_v2  ;;  %v1403_v59 = vsub.f32 0.0, %v2048_v27  ;;  %v937_v7 = vpop.f32.mrb[2].mxu0  ;;  %v1091_v8 = vpop.f32.mrb[10].mxu1 }
 0x258   :  { %v1414_v9 = vmul.f32 1.442695, %v1400_v3  ;;  %v1418_v29 = vmul.f32 1.442695, %v1402_v4  ;;  %v2045_v10 = vadd.f32 %v937_v7, %v756_v55  ;;  %v2049_v11 = vadd.f32 %v1091_v8, %v764_v56  ;;  %v939_v12 = vpop.f32.mrb[3].mxu0  ;;  %v1093_v44 = vpop.f32.mrb[11].mxu1 }
 0x259   :  { %v1416_v13 = vmul.f32 1.442695, %v1401_v5  ;;  %v1420_v14 = vmul.f32 1.442695, %v1403_v59  ;;  %v2046_v15 = vadd.f32 %v939_v12, %v760_v22  ;;  %v2050_v16 = vadd.f32 %v1093_v44, %v768_v42 }
 0x25a   :  { %2080 = vpow2.f32 %v1414_v9  ;;  %v1407_v17 = vsub.f32 0.0, %v2045_v10  ;;  %v1409_v18 = vsub.f32 0.0, %v2049_v11 }
 0x25b   :  { %2082 = vpow2.f32 %v1418_v29  ;;  %v1408_v19 = vsub.f32 0.0, %v2046_v15  ;;  %v1410_v20 = vsub.f32 0.0, %v2050_v16  ;;  %v771_v15 = vsub.s32 4, %v2394_v26 }
 0x25c   :  { %2084 = vpow2.f32 %v1416_v13  ;;  %v1428_v23 = vmul.f32 1.442695, %v1407_v17  ;;  %v1432_v24 = vmul.f32 1.442695, %v1409_v18  ;;  %v775_v16 = vsub.s32 5, %v2394_v26 }
 0x25d   :  { %2086 = vpow2.f32 %v1420_v14  ;;  %v1430_v25 = vmul.f32 1.442695, %v1408_v19  ;;  %v1434_v30 = vmul.f32 1.442695, %v1410_v20  ;;  %v772_v17 = vrot.slane %v2475_v54, %v771_v15 }
 0x25e   :  { %2088 = vpow2.f32 %v1428_v23  ;;  %v776_v18 = vrot.slane %v2475_v54, %v775_v16 }
 0x25f   :  { %2090 = vpow2.f32 %v1432_v24 }
 0x260   :  { %2092 = vpow2.f32 %v1430_v25 }
 0x261   :  { %2094 = vpow2.f32 %v1434_v30 }
 0x264   :  { %v2081_v31 = vpop.eup %2080 }
 0x265   :  { %v2083_v28 = vpop.eup %2082  ;;  %v1442_v33 = vadd.f32 1.0, %v2081_v31 }
 0x266   :  { %v2085_v45 = vpop.eup %2084  ;;  %v1444_v34 = vadd.f32 1.0, %v2083_v28 }
 0x267   :  { %v2087_v51 = vpop.eup %2086  ;;  %2096 = vrcp.f32 %v1442_v33  ;;  %v1443_v0 = vadd.f32 1.0, %v2085_v45 }
 0x268   :  { %v2089_v35 = vpop.eup %2088  ;;  %2098 = vrcp.f32 %v1444_v34  ;;  %v1445_v36 = vadd.f32 1.0, %v2087_v51 }
 0x269   :  { %v2091_v37 = vpop.eup %2090  ;;  %2100 = vrcp.f32 %v1443_v0  ;;  %v1449_v38 = vadd.f32 1.0, %v2089_v35 }
 0x26a   :  { %v2093_v39 = vpop.eup %2092  ;;  %2102 = vrcp.f32 %v1445_v36  ;;  %v1451_v40 = vadd.f32 1.0, %v2091_v37 }
 0x26b   :  { %v2095_v41 = vpop.eup %2094  ;;  %2104 = vrcp.f32 %v1449_v38  ;;  %v1450_v1 = vadd.f32 1.0, %v2093_v39 }
 0x26c   :  { %2106 = vrcp.f32 %v1451_v40  ;;  %v1452_v6 = vadd.f32 1.0, %v2095_v41 }
 0x26d   :  { %2108 = vrcp.f32 %v1450_v1 }
 0x26e   :  { %2110 = vrcp.f32 %v1452_v6 }
 0x271   :  { %v2097_v43 = vpop.eup %2096 }
 0x272   :  { %v2099_v46 = vpop.eup %2098  ;;  %1470 = vst [vmem:[#allocation11] sm:$0xff] %v2097_v43 }
 0x273   :  { %v2101_v21 = vpop.eup %2100  ;;  %1472 = vst [vmem:[#allocation11 + $0x10] sm:$0xff] %v2099_v46 }
 0x274   :  { %v2103_v47 = vpop.eup %2102  ;;  %1471 = vst [vmem:[#allocation11 + $0x8] sm:$0xff] %v2101_v21  ;;  %v1543_v48 = vpop.f32.mrb[12].mxu1 }
 0x275   :  { %v2105_v49 = vpop.eup %2104  ;;  %1473 = vst [vmem:[#allocation11 + $0x18] sm:$0xff] %v2103_v47  ;;  %v1544_v63 = vpop.f32.mrb[13].mxu1 }
 0x276   :  { %v2107_v32 = vpop.eup %2106  ;;  %1477 = vst [vmem:[#allocation11 + $0x38] sm:$0xff] %v2105_v49  ;;  %v1545_v52 = vadd.f32 %v1544_v63, %v1543_v48 }
 0x277   :  { %v2109_v53 = vpop.eup %2108  ;;  %1479 = vst [vmem:[#allocation11 + $0x48] sm:$0xff] %v2107_v32 }
 0x278   :  { %v2111_v55 = vpop.eup %2110  ;;  %1478 = vst [vmem:[#allocation11 + $0x40] sm:$0xff] %v2109_v53  ;;  %v1546_v56 = vpop.f32.mrb[14].mxu1  ;;  %v1317_v61 = vadd.f32 %v1545_v52, %v780_v57 }
 0x279   :  { %1480 = vst [vmem:[#allocation11 + $0x50] sm:$0xff] %v2111_v55  ;;  %v1547_v22 = vpop.f32.mrb[15].mxu1 }
 0x27a   :  { %v1548_v42 = vadd.f32 %v1547_v22, %v1546_v56 }
 0x27c   :  { %v1322_v4 = vadd.f32 %v1548_v42, %v780_v57 }
 0x294   :  { %v1581_v58 = vpop.f32.mrb[16].mxu1 }
 0x295   :  { %v1582_v60 = vpop.f32.mrb[17].mxu1 }
 0x296   :  { %v1583_v62 = vadd.f32 %v1582_v60, %v1581_v58 }
 0x298   :  { %v1392_v2 = vadd.f32 %v1583_v62, %v1317_v61  ;;  %v1584_v27 = vpop.f32.mrb[18].mxu1 }
 0x299   :  { %v1585_v3 = vpop.f32.mrb[19].mxu1 }
 0x29a   :  { %v1406_v5 = vsub.f32 0.0, %v1392_v2  ;;  %v1586_v59 = vadd.f32 %v1585_v3, %v1584_v27 }
 0x29c   :  { %v1426_v7 = vmul.f32 1.442695, %v1406_v5  ;;  %v1397_v8 = vadd.f32 %v1586_v59, %v1322_v4 }
 0x29e   :  { %2112 = vpow2.f32 %v1426_v7  ;;  %v1413_v9 = vsub.f32 0.0, %v1397_v8 }
 0x2a0   :  { %v1440_v29 = vmul.f32 1.442695, %v1413_v9 }
 0x2a2   :  { %2114 = vpow2.f32 %v1440_v29 }
 0x2a8   :  { %v2113_v10 = vpop.eup %2112 }
 0x2a9   :  { %v1448_v11 = vadd.f32 1.0, %v2113_v10 }
 0x2ab   :  { %2116 = vrcp.f32 %v1448_v11 }
 0x2ac   :  { %v2115_v12 = vpop.eup %2114 }
 0x2ad   :  { %v1455_v44 = vadd.f32 1.0, %v2115_v12 }
 0x2af   :  { %2118 = vrcp.f32 %v1455_v44 }
 0x2b5   :  { %v2117_v13 = vpop.eup %2116 }
 0x2b6   :  { %1476 = vst [vmem:[#allocation11 + $0x30] sm:$0xff] %v2117_v13 }
 0x2b9   :  { %v2119_v14 = vpop.eup %2118 }
 0x2ba   :  { %1483 = vst [vmem:[#allocation11 + $0x68] sm:$0xff] %v2119_v14 }
 0x2d4   :  { %v1239_v19 = vpop.f32.mrb[4].mxu0 }
 0x2d5   :  { %v2051_v20 = vadd.f32 %v1239_v19, %v772_v17  ;;  %v1241_v23 = vpop.f32.mrb[5].mxu0 }
 0x2d6   :  { %v2052_v24 = vadd.f32 %v1241_v23, %v776_v18 }
 0x2d7   :  { %v1404_v25 = vsub.f32 0.0, %v2051_v20 }
 0x2d8   :  { %v1405_v30 = vsub.f32 0.0, %v2052_v24  ;;  %v1245_v31 = vpop.f32.mrb[6].mxu0 }
 0x2d9   :  { %v1422_v28 = vmul.f32 1.442695, %v1404_v25  ;;  %v2053_v33 = vadd.f32 %v1245_v31, %v772_v17  ;;  %v1247_v45 = vpop.f32.mrb[7].mxu0 }
 0x2da   :  { %v1424_v34 = vmul.f32 1.442695, %v1405_v30  ;;  %v2054_v51 = vadd.f32 %v1247_v45, %v776_v18 }
 0x2db   :  { %2120 = vpow2.f32 %v1422_v28  ;;  %v1411_v0 = vsub.f32 0.0, %v2053_v33 }
 0x2dc   :  { %2122 = vpow2.f32 %v1424_v34  ;;  %v1412_v26 = vsub.f32 0.0, %v2054_v51 }
 0x2dd   :  { %v1436_v35 = vmul.f32 1.442695, %v1411_v0 }
 0x2de   :  { %v1438_v36 = vmul.f32 1.442695, %v1412_v26 }
 0x2df   :  { %2124 = vpow2.f32 %v1436_v35 }
 0x2e0   :  { %2126 = vpow2.f32 %v1438_v36 }
 0x2e5   :  { %v2121_v54 = vpop.eup %2120 }
 0x2e6   :  { %v2123_v37 = vpop.eup %2122  ;;  %v1446_v38 = vadd.f32 1.0, %v2121_v54 }
 0x2e7   :  { %v1447_v39 = vadd.f32 1.0, %v2123_v37 }
 0x2e8   :  { %2128 = vrcp.f32 %v1446_v38 }
 0x2e9   :  { %v2125_v40 = vpop.eup %2124  ;;  %2130 = vrcp.f32 %v1447_v39 }
 0x2ea   :  { %v2127_v41 = vpop.eup %2126  ;;  %v1453_v1 = vadd.f32 1.0, %v2125_v40 }
 0x2eb   :  { %v1454_v6 = vadd.f32 1.0, %v2127_v41 }
 0x2ec   :  { %2132 = vrcp.f32 %v1453_v1 }
 0x2ed   :  { %2134 = vrcp.f32 %v1454_v6 }
 0x2f2   :  { %v2129_v43 = vpop.eup %2128 }
 0x2f3   :  { %v2131_v46 = vpop.eup %2130  ;;  %1474 = vst [vmem:[#allocation11 + $0x20] sm:$0xff] %v2129_v43 }
 0x2f4   :  { %1475 = vst [vmem:[#allocation11 + $0x28] sm:$0xff] %v2131_v46 }
 0x2f6   :  { %v2133_v21 = vpop.eup %2132 }
 0x2f7   :  { %v2135_v47 = vpop.eup %2134  ;;  %1481 = vst [vmem:[#allocation11 + $0x58] sm:$0xff] %v2133_v21 }
 0x2f8   :  { %1482 = vst [vmem:[#allocation11 + $0x60] sm:$0xff] %v2135_v47 }
 0x2f9   :  { %2257 = shalt.err (!%p2254_p2)
}
 0x2fa   :  { %s2258_s10 = scalar_lea.hbm %s2515_s5, 1792 }
 0x2fb   :  { %p2259_p3 = scmp.ne.s32.totalorder %s2515_s5, %s2258_s10  ;;  %p2262_p4 = scmp.lt.u32.totalorder %s2258_s10, %s2515_s5 }
 0x2fd   :  { %p2264_p5 = pnand %p2262_p4, %p2259_p3 }
 0x2ff   :  { %2267 = shalt.err (!%p2264_p5)
}
 0x300   :  { %1495 = dma.vmem_to_hbm [thread:$0]  %s1490_s6, 1792, %s2515_s5, [#allocation4], %s2280_s1, %s2280_s1, %s2281_s17  }
 0x301   :  { %2274 = dma.done.wait [#allocation4], 1792  }
 0x302   :  { %2275 = vsyncadd [#allocation4], 4294965504 }
 0x303   :  { %1499 = vsyncpa [#allocation3], 1 }
 0x304   :  { %1500 = vsyncpa [#allocation6], 1 }
 0x305   :  { %1501 = vsyncpa [#allocation9], 1 }
 0x306   :  { %1502 = vsyncpa [#allocation4], 1 }

</bundles_post_ra>
